<compile_context>
chip_gen: v7x
topology: tpu7x:2x2x1
jax: 0.10.0
libtpu: 0.0.40
codegen_flags: <defaults>
</compile_context>

<pallas_src>
import math
from functools import partial

import jax
import jax.numpy as jnp
from jax.experimental import pallas as pl
from jax.experimental.pallas import tpu as pltpu
from jax.scipy.special import erf, erfinv


CLIP_MEAN = jnp.array([0.48145466, 0.4578275, 0.40821073], dtype=jnp.float32)
CLIP_STD = jnp.array([0.26862954, 0.26130258, 0.27577711], dtype=jnp.float32)


class SphericalAverageError(Exception):
    pass


# --------------------------------------------------------------------------
# Fused Pallas kernel: bilinear batch_crop (separable grid_sample) + synthetic
# linear image encoder, one grid step, everything resident in VMEM/vregs.
# --------------------------------------------------------------------------

def _fused_clip_kernel(img_ref, wy_ref, wxbd_ref, w3_ref, b_ref, emb_ref, cut_ref):
    """Single grid step computes every cutout and its embedding.

    img_ref : (1, Hp, C*Wp)      bf16 normalized padded image, [0, h, c*Wp + w]
    wy_ref  : (cutn, R, Hp)      bf16 per-cutout row-pass bilinear weights
    wxbd_ref: (cutn, C*Wp, C*R)  bf16 per-cutout block-diag-over-channel col weights
    w3_ref  : (R, C*R, D)        bf16 encoder weights regrouped per output row r
    b_ref   : (1, D)             f32 encoder bias
    emb_ref : (cutn, D)          f32 output embeddings
    cut_ref : (cutn, R, C*R)     bf16 VMEM scratch (single contiguous store)
    """
    cutn, R, _ = cut_ref.shape
    _, Hp, CWp = img_ref.shape
    D = emb_ref.shape[1]

    # (1) Row pass, batched over cutouts (leading-batch einsum -> MXU).  The
    #     image is replicated across the batch dim in vregs (no extra DMA).
    img_b = jnp.broadcast_to(img_ref[...], (cutn, Hp, CWp))
    tmp = jnp.einsum('nrh,nhw->nrw', wy_ref[...], img_b,
                     preferred_element_type=jnp.float32)
    tmp = tmp.astype(jnp.bfloat16)                          # (cutn, R, C*Wp)

    # (2) Column pass: one batched matmul against the block-diagonal-over-channel
    #     RHS.  Result staged to the scratch with ONE contiguous store (no
    #     per-cutout masked sublane-strided stores).
    cuts = jnp.einsum('nrw,nwk->nrk', tmp, wxbd_ref[...],
                      preferred_element_type=jnp.float32)
    cut_ref[...] = cuts.astype(jnp.bfloat16)                # (cutn, R, C*R)

    # (3) Synthetic linear image encoder, accumulated in vregs over the R output
    #     rows: bf16 x bf16 -> f32 MXU dots, f32 accumulator, unpadded D lanes.
    # TODO(synk): a real pretrained CLIP ViT is not reproduced; at real CLIP
    # scale this becomes a K-tiled grid (tiles sized for v7x's 64 MiB VMEM) with
    # a leading "parallel" axis over cutouts so v7x's second TensorCore works.
    acc = jnp.zeros((cutn, D), dtype=jnp.float32)
    for r in range(R):                                      # static unroll, R small
        acc = acc + jnp.dot(cut_ref[:, r, :], w3_ref[r],
                            preferred_element_type=jnp.float32)
    emb_ref[...] = acc + b_ref[...]


def fused_crop_encode_pallas(img3, wy3, wxbd, w3, b):
    """img3: (1, Hp, C*Wp) bf16; wy3: (cutn, R, Hp) bf16;
    wxbd: (cutn, C*Wp, C*R) bf16; w3: (R, C*R, D) bf16; b: (1, D) f32
    -> (cutn, D) f32 embeddings."""
    _, Hp, CWp = img3.shape
    cutn, R, _ = wy3.shape
    CR = wxbd.shape[-1]
    D = w3.shape[-1]
    return pl.pallas_call(
        _fused_clip_kernel,
        out_shape=jax.ShapeDtypeStruct((cutn, D), jnp.float32),
        grid=(1,),
        in_specs=[
            pl.BlockSpec((1, Hp, CWp), lambda i: (0, 0, 0)),
            pl.BlockSpec((cutn, R, Hp), lambda i: (0, 0, 0)),
            pl.BlockSpec((cutn, CWp, CR), lambda i: (0, 0, 0)),
            pl.BlockSpec((R, CR, D), lambda i: (0, 0, 0)),
            pl.BlockSpec((1, D), lambda i: (0, 0)),
        ],
        out_specs=pl.BlockSpec((cutn, D), lambda i: (0, 0)),
        scratch_shapes=[pltpu.VMEM((cutn, R, CR), jnp.bfloat16)],
        compiler_params=pltpu.CompilerParams(
            dimension_semantics=("arbitrary",)),
    )(img3, wy3, wxbd, w3, b)


# --------------------------------------------------------------------------
# One-time parameter packing (hoisted out of the per-call jit).
# --------------------------------------------------------------------------

def pack_encoder_weights(w_enc, channels, input_resolution):
    """w_enc: (C*R*R, D) with rows ordered (c, r, k) -> (R, C*R, D) bf16 so the
    kernel's encoder contraction is per output row r over (c, k)."""
    C, R = channels, input_resolution
    D = w_enc.shape[1]
    w3 = jnp.transpose(w_enc.reshape(C, R, R, D), (1, 0, 2, 3)).reshape(R, C * R, D)
    return w3.astype(jnp.bfloat16)


# --------------------------------------------------------------------------
# Plain-JAX glue (semantics identical to the PyTorch reference)
# --------------------------------------------------------------------------

def _projx(x):
    return x / jnp.linalg.norm(x, axis=-1, keepdims=True)


def _proju(x, u):
    return u - jnp.sum(x * u, axis=-1, keepdims=True) * x


def _dist(u, v, keepdim=False):
    nrm = jnp.linalg.norm(u - v, axis=-1, keepdims=keepdim)
    return 2.0 * jnp.arcsin(nrm / 2.0)


def _logmap(x, y):
    u = _proju(x, y - x)
    d = _dist(x, y, keepdim=True)
    result = u * d / jnp.linalg.norm(u, axis=-1, keepdims=True)
    return jnp.where(d > 0.0001, result, u)


def _retr(x, u):
    return _projx(x + u)


def spherical_average(p, w=None, tol=0.0001):
    """Device-side iteration (lax.while_loop); error checks are one host read."""
    RUNNING, CONVERGED, NOT_FINITE, NOT_DECREASING = 0, 1, 2, 3

    p = p.astype(jnp.float32)
    if w is None:
        w = jnp.ones(p.shape[:-1], dtype=p.dtype)
    w = w / jnp.sum(w, axis=-1, keepdims=True)
    w = w[..., None]
    p = _projx(p)
    q0 = _projx(jnp.sum(p * w, axis=-2))

    def body(state):
        q, norm_prev, _ = state
        p_star = _logmap(q[..., None, :], p)
        rgrad = jnp.sum(p_star * w, axis=-2)
        q_new = _retr(q, rgrad)
        norm = jnp.max(jnp.linalg.norm(rgrad, axis=-1))
        status = jnp.where(
            ~jnp.isfinite(norm), NOT_FINITE,
            jnp.where(norm >= norm_prev, NOT_DECREASING,
                      jnp.where(norm <= tol, CONVERGED, RUNNING))).astype(jnp.int32)
        return q_new, norm, status

    def cond(state):
        return state[2] == RUNNING

    init = (q0, jnp.array(jnp.inf, jnp.float32), jnp.array(RUNNING, jnp.int32))
    q, _, status = jax.lax.while_loop(cond, body, init)

    status = int(status)  # single device->host sync for the error checks
    if status == NOT_FINITE:
        raise SphericalAverageError("grad norm is not finite")
    if status == NOT_DECREASING:
        raise SphericalAverageError("grad norm did not decrease")
    return q


def _axis_weights(g, size):
    # g: (cutn, R) normalized coords in [-1, 1].  align_corners=False bilinear
    # taps with zero padding outside [0, size-1] -> dense (cutn, R, size).
    # NOTE: the PyTorch reference normalizes corners by (size-1) but samples
    # with align_corners=False; both sides here mirror exactly that convention.
    f = ((g + 1.0) * size - 1.0) / 2.0
    i0 = jnp.floor(f)
    i1 = i0 + 1.0
    w1 = f - i0
    w0 = 1.0 - w1
    idx = jnp.arange(size, dtype=jnp.int32)

    def tap(i, wgt):
        inb = ((i >= 0) & (i <= size - 1)).astype(jnp.float32)
        onehot = (idx[None, None, :] == i.astype(jnp.int32)[..., None]
                  ).astype(jnp.float32)
        return onehot * (wgt * inb)[..., None]

    return tap(i0, w0) + tap(i1, w1)


def _crop_encode_reference(xp_norm, wy, wxT, w_enc, b_enc):
    # Pure-f32 semantic reference of the fused kernel.
    cuts = jnp.einsum('nrh,chw,nwk->ncrk', wy, xp_norm, wxT, precision='highest')
    feats = cuts.reshape(cuts.shape[0], -1)
    return jnp.dot(feats, w_enc, precision='highest') + b_enc


def _crop_encode_matched(xp_norm, wy, wxT, w_enc, b_enc):
    # Reference that mirrors the kernel's bf16 rounding points, for a tight check.
    bf16, f32 = jnp.bfloat16, jnp.float32
    xpn = xp_norm.astype(bf16).astype(f32)
    wyr = wy.astype(bf16).astype(f32)
    wxr = wxT.astype(bf16).astype(f32)
    w_e = w_enc.astype(bf16).astype(f32)
    tmp = jnp.einsum('nrh,chw->ncrw', wyr, xpn, precision='highest')
    tmp = tmp.astype(bf16).astype(f32)
    cuts = jnp.einsum('ncrw,nwk->ncrk', tmp, wxr, precision='highest')
    cuts = cuts.astype(bf16).astype(f32)
    feats = cuts.reshape(cuts.shape[0], -1)
    return jnp.dot(feats, w_e, precision='highest') + b_enc


@partial(jax.jit, static_argnames=("input_resolution", "cutn", "mode"))
def _compute_embeds(x, norm_mean, norm_std, w_enc, b_enc, w3_packed, key, *,
                    input_resolution, cutn, mode):
    n, C, h, w = x.shape
    if n != 1:
        raise ValueError("batch_crop() only works with a single image")
    R = input_resolution
    min_size = R
    max_size = min(w, h)
    pad_size = max(w, h)
    pad_w, pad_h = (pad_size - w) // 2, (pad_size - h) // 2

    # ---- mean_pad ----
    x_mean = jnp.mean(x, axis=(2, 3), keepdims=True)
    pads = ((0, 0), (0, 0), (pad_h, pad_h), (pad_w, pad_w))
    x_zero = jnp.pad(x, pads)
    mask = jnp.pad(jnp.zeros_like(x), pads, constant_values=1.0)
    xp = x_zero + mask * x_mean                                # (1, C, Hp, Wp)
    Hp, Wp = xp.shape[2], xp.shape[3]

    # ---- stratified sampling of cutout sizes from Normal(0.8*m, 0.3*m) ----
    mu = 0.8 * max_size
    sigma = 0.3 * max_size
    sqrt2 = math.sqrt(2.0)
    cdf = lambda v: 0.5 * (1.0 + erf((v - mu) / (sigma * sqrt2)))
    icdf = lambda p_: mu + sigma * sqrt2 * erfinv(2.0 * p_ - 1.0)
    strata = jnp.linspace(cdf(jnp.float32(min_size)),
                          cdf(jnp.float32(pad_size)), cutn + 1)
    k_u, k_perm, k_ox, k_oy = jax.random.split(key, 4)
    u = jax.random.uniform(k_u, (cutn,), dtype=strata.dtype)
    samples = u * (strata[1:] - strata[:-1]) + strata[:-1]
    samples = jax.random.permutation(k_perm, samples)          # shuffle
    size = icdf(samples)

    offsetx = jax.random.uniform(k_ox, (cutn,)) * (pad_size - size)
    offsety = jax.random.uniform(k_oy, (cutn,)) * (pad_size - size)
    offsets = jnp.stack([offsety, offsetx], axis=-1)           # (cutn, 2)
    corners = jnp.stack([offsets, offsets + size[:, None]], axis=-1)  # (cutn,2,2)

    # ---- corners -> separable bilinear weight matrices (grid_sample) ----
    corners_n = corners / jnp.array([Hp - 1, Wp - 1],
                                    jnp.float32)[None, :, None] * 2.0 - 1.0
    scales = corners_n[:, :, 1] - corners_n[:, :, 0]
    shifts = corners_n[:, :, 0]
    ramp = jnp.linspace(0.0, 1.0, R)
    gy = ramp[None, :] * scales[:, 0:1] + shifts[:, 0:1]       # (cutn, R)
    gx = ramp[None, :] * scales[:, 1:2] + shifts[:, 1:2]       # (cutn, R)
    wy = _axis_weights(gy, Hp)                                 # (cutn, R, Hp)
    wxT = jnp.swapaxes(_axis_weights(gx, Wp), 1, 2)            # (cutn, Wp, R)

    # ---- CLIP preprocess hoisted out of the kernel (applied once) ----
    xp_norm = (xp[0] - norm_mean[:, None, None]) / norm_std[:, None, None]  # (C,Hp,Wp)

    if mode == "ref_f32":
        return _crop_encode_reference(xp_norm, wy, wxT, w_enc, b_enc)
    if mode == "ref_bf16":
        return _crop_encode_matched(xp_norm, wy, wxT, w_enc, b_enc)

    # ---- wrapper-side layout plumbing for the fused kernel (bf16 operands) ----
    img2 = jnp.transpose(xp_norm, (1, 0, 2)).reshape(Hp, C * Wp)
    img3 = img2[None].astype(jnp.bfloat16)                     # (1, Hp, C*Wp)
    wy_bf = wy.astype(jnp.bfloat16)                            # (cutn, R, Hp)
    # Block-diagonal-over-channel column weights: (cutn, C*Wp, C*R).
    wxbd = (jnp.eye(C, dtype=jnp.float32)[None, :, None, :, None]
            * wxT[:, None, :, None, :]).reshape(cutn, C * Wp, C * R)
    wxbd = wxbd.astype(jnp.bfloat16)

    return fused_crop_encode_pallas(img3, wy_bf, wxbd, w3_packed,
                                    b_enc.astype(jnp.float32))  # (cutn, D)


def compute_embeds(x, params, key, mode="pallas"):
    return _compute_embeds(
        x, params["norm_mean"], params["norm_std"], params["w_enc"],
        params["b_enc"], params["w3_packed"], key,
        input_resolution=params["input_resolution"], cutn=params["cutn"],
        mode=mode)


def clip_wrapper_forward(x, params, key, mode="pallas"):
    embeds = compute_embeds(x, params, key, mode=mode)
    return spherical_average(embeds), embeds


# --------------------------------------------------------------------------

if __name__ == "__main__":
    key = jax.random.PRNGKey(0)
    k_x, k_w, k_b, k_fwd = jax.random.split(key, 4)

    C, H, W = 3, 20, 24        # single NCHW image (batch must be 1)
    cutn = 8                   # number of cutouts
    R = 16                     # synthetic model.visual.input_resolution
    D = 32                     # synthetic embedding dim
    F_dim = C * R * R

    x = jax.random.uniform(k_x, (1, C, H, W), minval=-1.0, maxval=1.0,
                           dtype=jnp.float32)

    params = dict(
        input_resolution=R,
        cutn=cutn,
        norm_mean=(CLIP_MEAN * 2.0 - 1.0),     # preprocess = Normalize(m*2-1, s*2)
        norm_std=(CLIP_STD * 2.0),
        w_enc=0.02 * jax.random.normal(k_w, (F_dim, D), dtype=jnp.float32),
        b_enc=3.0 * jax.random.normal(k_b, (1, D), dtype=jnp.float32),
    )
    # One-time weight packing (hoisted out of the per-call jit, review item 5).
    params["w3_packed"] = pack_encoder_weights(params["w_enc"], C, R)

    q_pl, emb_pl = clip_wrapper_forward(x, params, k_fwd, mode="pallas")
    emb_bf = compute_embeds(x, params, k_fwd, mode="ref_bf16")
    emb_f32 = compute_embeds(x, params, k_fwd, mode="ref_f32")
    q_pl, emb_pl, emb_bf, emb_f32 = jax.block_until_ready(
        (q_pl, emb_pl, emb_bf, emb_f32))

    assert q_pl.shape == (D,)
    assert emb_pl.shape == (cutn, D)
    assert bool(jnp.all(jnp.isfinite(q_pl)))

    # Tight check vs. a reference with the kernel's exact bf16 rounding points.
    err_tight = float(jnp.max(jnp.abs(emb_pl - emb_bf)))
    assert bool(jnp.allclose(emb_pl, emb_bf, rtol=5e-3, atol=5e-3)), err_tight
    # Semantic check vs. the pure-f32 reference (bf16 operand rounding only).
    err_sem = float(jnp.max(jnp.abs(emb_pl - emb_f32)))
    assert bool(jnp.allclose(emb_pl, emb_f32, rtol=5e-2, atol=5e-2)), err_sem

    print("KERNEL_OK")
</pallas_src>

<mosaic_0001>
module attributes {stable_mosaic.version = 11 : i64} {
  func.func @_fused_clip_kernel(%arg0: i32, %arg1: memref<1x24x72xbf16, #tpu.memory_space<vmem>>, %arg2: memref<8x16x24xbf16, #tpu.memory_space<vmem>>, %arg3: memref<8x72x48xbf16, #tpu.memory_space<vmem>>, %arg4: memref<16x48x32xbf16, #tpu.memory_space<vmem>>, %arg5: memref<1x32xf32, #tpu.memory_space<vmem>>, %arg6: memref<8x32xf32, #tpu.memory_space<vmem>>, %arg7: memref<8x16x48xbf16, #tpu.memory_space<vmem>>) attributes {dimension_semantics = [#tpu.dimension_semantics<arbitrary>], iteration_bounds = array<i64: 1>, scalar_prefetch = 0 : i64, scratch_operands = 1 : i64, tpu.core_type = #tpu.core_type<tc>, window_params = [{pipeline_mode = #tpu.pipeline_mode<synchronous>, transform_indices = @transform_0, window_bounds = array<i64: 1, 24, 72>}, {pipeline_mode = #tpu.pipeline_mode<synchronous>, transform_indices = @transform_1, window_bounds = array<i64: 8, 16, 24>}, {pipeline_mode = #tpu.pipeline_mode<synchronous>, transform_indices = @transform_2, window_bounds = array<i64: 8, 72, 48>}, {pipeline_mode = #tpu.pipeline_mode<synchronous>, transform_indices = @transform_3, window_bounds = array<i64: 16, 48, 32>}, {pipeline_mode = #tpu.pipeline_mode<synchronous>, transform_indices = @transform_4, window_bounds = array<i64: 1, 32>}, {pipeline_mode = #tpu.pipeline_mode<synchronous>, transform_indices = @transform_5, window_bounds = array<i64: 8, 32>}]} {
    %c0 = arith.constant 0 : index
    %c0_0 = arith.constant 0 : index
    %c0_1 = arith.constant 0 : index
    %0 = vector.load %arg1[%c0, %c0_0, %c0_1] : memref<1x24x72xbf16, #tpu.memory_space<vmem>>, vector<1x24x72xbf16>
    %1 = vector.shape_cast %0 : vector<1x24x72xbf16> to vector<1x24x72xbf16>
    %2 = vector.broadcast %1 : vector<1x24x72xbf16> to vector<8x24x72xbf16>
    %c0_2 = arith.constant 0 : index
    %c0_3 = arith.constant 0 : index
    %c0_4 = arith.constant 0 : index
    %3 = vector.load %arg2[%c0_2, %c0_3, %c0_4] : memref<8x16x24xbf16, #tpu.memory_space<vmem>>, vector<8x16x24xbf16>
    "tpu.trace_start"() <{level = 10 : i32, message = "nrh,nhw->nrw"}> : () -> ()
    %cst = arith.constant dense<0.000000e+00> : vector<8x16x72xf32>
    %4 = tpu.matmul %3, %2, %cst {dimension_numbers = #tpu.dot_dimension_numbers<[2], [1], [1], [2], [0, 0, 0, 1, 1, 2], [0], [0]>} : vector<8x16x24xbf16>, vector<8x24x72xbf16>, vector<8x16x72xf32> -> vector<8x16x72xf32>
    "tpu.trace_stop"() : () -> ()
    %5 = arith.truncf %4 : vector<8x16x72xf32> to vector<8x16x72xbf16>
    %c0_5 = arith.constant 0 : index
    %c0_6 = arith.constant 0 : index
    %c0_7 = arith.constant 0 : index
    %6 = vector.load %arg3[%c0_5, %c0_6, %c0_7] : memref<8x72x48xbf16, #tpu.memory_space<vmem>>, vector<8x72x48xbf16>
    "tpu.trace_start"() <{level = 10 : i32, message = "nrw,nwk->nrk"}> : () -> ()
    %cst_8 = arith.constant dense<0.000000e+00> : vector<8x16x48xf32>
    %7 = tpu.matmul %5, %6, %cst_8 {dimension_numbers = #tpu.dot_dimension_numbers<[2], [1], [1], [2], [0, 0, 0, 1, 1, 2], [0], [0]>} : vector<8x16x72xbf16>, vector<8x72x48xbf16>, vector<8x16x48xf32> -> vector<8x16x48xf32>
    "tpu.trace_stop"() : () -> ()
    %8 = arith.truncf %7 : vector<8x16x48xf32> to vector<8x16x48xbf16>
    %c0_9 = arith.constant 0 : index
    %c0_10 = arith.constant 0 : index
    %c0_11 = arith.constant 0 : index
    %9 = vector.load %arg7[%c0_9, %c0_10, %c0_11] : memref<8x16x48xbf16, #tpu.memory_space<vmem>>, vector<8x16x48xbf16>
    tpu.vector_store %arg7[%c0_9, %c0_10, %c0_11], %8 {strides = array<i32>} : memref<8x16x48xbf16, #tpu.memory_space<vmem>>, vector<8x16x48xbf16>,
    %cst_12 = arith.constant 0.000000e+00 : f32
    %10 = vector.broadcast %cst_12 : f32 to vector<8x32xf32>
    %c0_13 = arith.constant 0 : index
    %c0_14 = arith.constant 0 : index
    %c0_15 = arith.constant 0 : index
    %11 = vector.load %arg7[%c0_13, %c0_14, %c0_15] : memref<8x16x48xbf16, #tpu.memory_space<vmem>>, vector<8x1x48xbf16>
    %12 = vector.shape_cast %11 : vector<8x1x48xbf16> to vector<8x48xbf16>
    %c0_16 = arith.constant 0 : index
    %c0_17 = arith.constant 0 : index
    %c0_18 = arith.constant 0 : index
    %13 = vector.load %arg4[%c0_16, %c0_17, %c0_18] : memref<16x48x32xbf16, #tpu.memory_space<vmem>>, vector<1x48x32xbf16>
    %14 = vector.shape_cast %13 : vector<1x48x32xbf16> to vector<48x32xbf16>
    %cst_19 = arith.constant dense<0.000000e+00> : vector<8x32xf32>
    %15 = tpu.matmul %12, %14, %cst_19 {dimension_numbers = #tpu.dot_dimension_numbers<[1], [0], [0], [1], [0, 0, 1, 1], [], []>} : vector<8x48xbf16>, vector<48x32xbf16>, vector<8x32xf32> -> vector<8x32xf32>
    %16 = arith.addf %10, %15 : vector<8x32xf32>
    %c0_20 = arith.constant 0 : index
    %c1 = arith.constant 1 : index
    %c0_21 = arith.constant 0 : index
    %17 = vector.load %arg7[%c0_20, %c1, %c0_21] : memref<8x16x48xbf16, #tpu.memory_space<vmem>>, vector<8x1x48xbf16>
    %18 = vector.shape_cast %17 : vector<8x1x48xbf16> to vector<8x48xbf16>
    %c1_22 = arith.constant 1 : index
    %c0_23 = arith.constant 0 : index
    %c0_24 = arith.constant 0 : index
    %19 = vector.load %arg4[%c1_22, %c0_23, %c0_24] : memref<16x48x32xbf16, #tpu.memory_space<vmem>>, vector<1x48x32xbf16>
    %20 = vector.shape_cast %19 : vector<1x48x32xbf16> to vector<48x32xbf16>
    %cst_25 = arith.constant dense<0.000000e+00> : vector<8x32xf32>
    %21 = tpu.matmul %18, %20, %cst_25 {dimension_numbers = #tpu.dot_dimension_numbers<[1], [0], [0], [1], [0, 0, 1, 1], [], []>} : vector<8x48xbf16>, vector<48x32xbf16>, vector<8x32xf32> -> vector<8x32xf32>
    %22 = arith.addf %16, %21 : vector<8x32xf32>
    %c0_26 = arith.constant 0 : index
    %c2 = arith.constant 2 : index
    %c0_27 = arith.constant 0 : index
    %23 = vector.load %arg7[%c0_26, %c2, %c0_27] : memref<8x16x48xbf16, #tpu.memory_space<vmem>>, vector<8x1x48xbf16>
    %24 = vector.shape_cast %23 : vector<8x1x48xbf16> to vector<8x48xbf16>
    %c2_28 = arith.constant 2 : index
    %c0_29 = arith.constant 0 : index
    %c0_30 = arith.constant 0 : index
    %25 = vector.load %arg4[%c2_28, %c0_29, %c0_30] : memref<16x48x32xbf16, #tpu.memory_space<vmem>>, vector<1x48x32xbf16>
    %26 = vector.shape_cast %25 : vector<1x48x32xbf16> to vector<48x32xbf16>
    %cst_31 = arith.constant dense<0.000000e+00> : vector<8x32xf32>
    %27 = tpu.matmul %24, %26, %cst_31 {dimension_numbers = #tpu.dot_dimension_numbers<[1], [0], [0], [1], [0, 0, 1, 1], [], []>} : vector<8x48xbf16>, vector<48x32xbf16>, vector<8x32xf32> -> vector<8x32xf32>
    %28 = arith.addf %22, %27 : vector<8x32xf32>
    %c0_32 = arith.constant 0 : index
    %c3 = arith.constant 3 : index
    %c0_33 = arith.constant 0 : index
    %29 = vector.load %arg7[%c0_32, %c3, %c0_33] : memref<8x16x48xbf16, #tpu.memory_space<vmem>>, vector<8x1x48xbf16>
    %30 = vector.shape_cast %29 : vector<8x1x48xbf16> to vector<8x48xbf16>
    %c3_34 = arith.constant 3 : index
    %c0_35 = arith.constant 0 : index
    %c0_36 = arith.constant 0 : index
    %31 = vector.load %arg4[%c3_34, %c0_35, %c0_36] : memref<16x48x32xbf16, #tpu.memory_space<vmem>>, vector<1x48x32xbf16>
    %32 = vector.shape_cast %31 : vector<1x48x32xbf16> to vector<48x32xbf16>
    %cst_37 = arith.constant dense<0.000000e+00> : vector<8x32xf32>
    %33 = tpu.matmul %30, %32, %cst_37 {dimension_numbers = #tpu.dot_dimension_numbers<[1], [0], [0], [1], [0, 0, 1, 1], [], []>} : vector<8x48xbf16>, vector<48x32xbf16>, vector<8x32xf32> -> vector<8x32xf32>
    %34 = arith.addf %28, %33 : vector<8x32xf32>
    %c0_38 = arith.constant 0 : index
    %c4 = arith.constant 4 : index
    %c0_39 = arith.constant 0 : index
    %35 = vector.load %arg7[%c0_38, %c4, %c0_39] : memref<8x16x48xbf16, #tpu.memory_space<vmem>>, vector<8x1x48xbf16>
    %36 = vector.shape_cast %35 : vector<8x1x48xbf16> to vector<8x48xbf16>
    %c4_40 = arith.constant 4 : index
    %c0_41 = arith.constant 0 : index
    %c0_42 = arith.constant 0 : index
    %37 = vector.load %arg4[%c4_40, %c0_41, %c0_42] : memref<16x48x32xbf16, #tpu.memory_space<vmem>>, vector<1x48x32xbf16>
    %38 = vector.shape_cast %37 : vector<1x48x32xbf16> to vector<48x32xbf16>
    %cst_43 = arith.constant dense<0.000000e+00> : vector<8x32xf32>
    %39 = tpu.matmul %36, %38, %cst_43 {dimension_numbers = #tpu.dot_dimension_numbers<[1], [0], [0], [1], [0, 0, 1, 1], [], []>} : vector<8x48xbf16>, vector<48x32xbf16>, vector<8x32xf32> -> vector<8x32xf32>
    %40 = arith.addf %34, %39 : vector<8x32xf32>
    %c0_44 = arith.constant 0 : index
    %c5 = arith.constant 5 : index
    %c0_45 = arith.constant 0 : index
    %41 = vector.load %arg7[%c0_44, %c5, %c0_45] : memref<8x16x48xbf16, #tpu.memory_space<vmem>>, vector<8x1x48xbf16>
    %42 = vector.shape_cast %41 : vector<8x1x48xbf16> to vector<8x48xbf16>
    %c5_46 = arith.constant 5 : index
    %c0_47 = arith.constant 0 : index
    %c0_48 = arith.constant 0 : index
    %43 = vector.load %arg4[%c5_46, %c0_47, %c0_48] : memref<16x48x32xbf16, #tpu.memory_space<vmem>>, vector<1x48x32xbf16>
    %44 = vector.shape_cast %43 : vector<1x48x32xbf16> to vector<48x32xbf16>
    %cst_49 = arith.constant dense<0.000000e+00> : vector<8x32xf32>
    %45 = tpu.matmul %42, %44, %cst_49 {dimension_numbers = #tpu.dot_dimension_numbers<[1], [0], [0], [1], [0, 0, 1, 1], [], []>} : vector<8x48xbf16>, vector<48x32xbf16>, vector<8x32xf32> -> vector<8x32xf32>
    %46 = arith.addf %40, %45 : vector<8x32xf32>
    %c0_50 = arith.constant 0 : index
    %c6 = arith.constant 6 : index
    %c0_51 = arith.constant 0 : index
    %47 = vector.load %arg7[%c0_50, %c6, %c0_51] : memref<8x16x48xbf16, #tpu.memory_space<vmem>>, vector<8x1x48xbf16>
    %48 = vector.shape_cast %47 : vector<8x1x48xbf16> to vector<8x48xbf16>
    %c6_52 = arith.constant 6 : index
    %c0_53 = arith.constant 0 : index
    %c0_54 = arith.constant 0 : index
    %49 = vector.load %arg4[%c6_52, %c0_53, %c0_54] : memref<16x48x32xbf16, #tpu.memory_space<vmem>>, vector<1x48x32xbf16>
    %50 = vector.shape_cast %49 : vector<1x48x32xbf16> to vector<48x32xbf16>
    %cst_55 = arith.constant dense<0.000000e+00> : vector<8x32xf32>
    %51 = tpu.matmul %48, %50, %cst_55 {dimension_numbers = #tpu.dot_dimension_numbers<[1], [0], [0], [1], [0, 0, 1, 1], [], []>} : vector<8x48xbf16>, vector<48x32xbf16>, vector<8x32xf32> -> vector<8x32xf32>
    %52 = arith.addf %46, %51 : vector<8x32xf32>
    %c0_56 = arith.constant 0 : index
    %c7 = arith.constant 7 : index
    %c0_57 = arith.constant 0 : index
    %53 = vector.load %arg7[%c0_56, %c7, %c0_57] : memref<8x16x48xbf16, #tpu.memory_space<vmem>>, vector<8x1x48xbf16>
    %54 = vector.shape_cast %53 : vector<8x1x48xbf16> to vector<8x48xbf16>
    %c7_58 = arith.constant 7 : index
    %c0_59 = arith.constant 0 : index
    %c0_60 = arith.constant 0 : index
    %55 = vector.load %arg4[%c7_58, %c0_59, %c0_60] : memref<16x48x32xbf16, #tpu.memory_space<vmem>>, vector<1x48x32xbf16>
    %56 = vector.shape_cast %55 : vector<1x48x32xbf16> to vector<48x32xbf16>
    %cst_61 = arith.constant dense<0.000000e+00> : vector<8x32xf32>
    %57 = tpu.matmul %54, %56, %cst_61 {dimension_numbers = #tpu.dot_dimension_numbers<[1], [0], [0], [1], [0, 0, 1, 1], [], []>} : vector<8x48xbf16>, vector<48x32xbf16>, vector<8x32xf32> -> vector<8x32xf32>
    %58 = arith.addf %52, %57 : vector<8x32xf32>
    %c0_62 = arith.constant 0 : index
    %c8 = arith.constant 8 : index
    %c0_63 = arith.constant 0 : index
    %59 = vector.load %arg7[%c0_62, %c8, %c0_63] : memref<8x16x48xbf16, #tpu.memory_space<vmem>>, vector<8x1x48xbf16>
    %60 = vector.shape_cast %59 : vector<8x1x48xbf16> to vector<8x48xbf16>
    %c8_64 = arith.constant 8 : index
    %c0_65 = arith.constant 0 : index
    %c0_66 = arith.constant 0 : index
    %61 = vector.load %arg4[%c8_64, %c0_65, %c0_66] : memref<16x48x32xbf16, #tpu.memory_space<vmem>>, vector<1x48x32xbf16>
    %62 = vector.shape_cast %61 : vector<1x48x32xbf16> to vector<48x32xbf16>
    %cst_67 = arith.constant dense<0.000000e+00> : vector<8x32xf32>
    %63 = tpu.matmul %60, %62, %cst_67 {dimension_numbers = #tpu.dot_dimension_numbers<[1], [0], [0], [1], [0, 0, 1, 1], [], []>} : vector<8x48xbf16>, vector<48x32xbf16>, vector<8x32xf32> -> vector<8x32xf32>
    %64 = arith.addf %58, %63 : vector<8x32xf32>
    %c0_68 = arith.constant 0 : index
    %c9 = arith.constant 9 : index
    %c0_69 = arith.constant 0 : index
    %65 = vector.load %arg7[%c0_68, %c9, %c0_69] : memref<8x16x48xbf16, #tpu.memory_space<vmem>>, vector<8x1x48xbf16>
    %66 = vector.shape_cast %65 : vector<8x1x48xbf16> to vector<8x48xbf16>
    %c9_70 = arith.constant 9 : index
    %c0_71 = arith.constant 0 : index
    %c0_72 = arith.constant 0 : index
    %67 = vector.load %arg4[%c9_70, %c0_71, %c0_72] : memref<16x48x32xbf16, #tpu.memory_space<vmem>>, vector<1x48x32xbf16>
    %68 = vector.shape_cast %67 : vector<1x48x32xbf16> to vector<48x32xbf16>
    %cst_73 = arith.constant dense<0.000000e+00> : vector<8x32xf32>
    %69 = tpu.matmul %66, %68, %cst_73 {dimension_numbers = #tpu.dot_dimension_numbers<[1], [0], [0], [1], [0, 0, 1, 1], [], []>} : vector<8x48xbf16>, vector<48x32xbf16>, vector<8x32xf32> -> vector<8x32xf32>
    %70 = arith.addf %64, %69 : vector<8x32xf32>
    %c0_74 = arith.constant 0 : index
    %c10 = arith.constant 10 : index
    %c0_75 = arith.constant 0 : index
    %71 = vector.load %arg7[%c0_74, %c10, %c0_75] : memref<8x16x48xbf16, #tpu.memory_space<vmem>>, vector<8x1x48xbf16>
    %72 = vector.shape_cast %71 : vector<8x1x48xbf16> to vector<8x48xbf16>
    %c10_76 = arith.constant 10 : index
    %c0_77 = arith.constant 0 : index
    %c0_78 = arith.constant 0 : index
    %73 = vector.load %arg4[%c10_76, %c0_77, %c0_78] : memref<16x48x32xbf16, #tpu.memory_space<vmem>>, vector<1x48x32xbf16>
    %74 = vector.shape_cast %73 : vector<1x48x32xbf16> to vector<48x32xbf16>
    %cst_79 = arith.constant dense<0.000000e+00> : vector<8x32xf32>
    %75 = tpu.matmul %72, %74, %cst_79 {dimension_numbers = #tpu.dot_dimension_numbers<[1], [0], [0], [1], [0, 0, 1, 1], [], []>} : vector<8x48xbf16>, vector<48x32xbf16>, vector<8x32xf32> -> vector<8x32xf32>
    %76 = arith.addf %70, %75 : vector<8x32xf32>
    %c0_80 = arith.constant 0 : index
    %c11 = arith.constant 11 : index
    %c0_81 = arith.constant 0 : index
    %77 = vector.load %arg7[%c0_80, %c11, %c0_81] : memref<8x16x48xbf16, #tpu.memory_space<vmem>>, vector<8x1x48xbf16>
    %78 = vector.shape_cast %77 : vector<8x1x48xbf16> to vector<8x48xbf16>
    %c11_82 = arith.constant 11 : index
    %c0_83 = arith.constant 0 : index
    %c0_84 = arith.constant 0 : index
    %79 = vector.load %arg4[%c11_82, %c0_83, %c0_84] : memref<16x48x32xbf16, #tpu.memory_space<vmem>>, vector<1x48x32xbf16>
    %80 = vector.shape_cast %79 : vector<1x48x32xbf16> to vector<48x32xbf16>
    %cst_85 = arith.constant dense<0.000000e+00> : vector<8x32xf32>
    %81 = tpu.matmul %78, %80, %cst_85 {dimension_numbers = #tpu.dot_dimension_numbers<[1], [0], [0], [1], [0, 0, 1, 1], [], []>} : vector<8x48xbf16>, vector<48x32xbf16>, vector<8x32xf32> -> vector<8x32xf32>
    %82 = arith.addf %76, %81 : vector<8x32xf32>
    %c0_86 = arith.constant 0 : index
    %c12 = arith.constant 12 : index
    %c0_87 = arith.constant 0 : index
    %83 = vector.load %arg7[%c0_86, %c12, %c0_87] : memref<8x16x48xbf16, #tpu.memory_space<vmem>>, vector<8x1x48xbf16>
    %84 = vector.shape_cast %83 : vector<8x1x48xbf16> to vector<8x48xbf16>
    %c12_88 = arith.constant 12 : index
    %c0_89 = arith.constant 0 : index
    %c0_90 = arith.constant 0 : index
    %85 = vector.load %arg4[%c12_88, %c0_89, %c0_90] : memref<16x48x32xbf16, #tpu.memory_space<vmem>>, vector<1x48x32xbf16>
    %86 = vector.shape_cast %85 : vector<1x48x32xbf16> to vector<48x32xbf16>
    %cst_91 = arith.constant dense<0.000000e+00> : vector<8x32xf32>
    %87 = tpu.matmul %84, %86, %cst_91 {dimension_numbers = #tpu.dot_dimension_numbers<[1], [0], [0], [1], [0, 0, 1, 1], [], []>} : vector<8x48xbf16>, vector<48x32xbf16>, vector<8x32xf32> -> vector<8x32xf32>
    %88 = arith.addf %82, %87 : vector<8x32xf32>
    %c0_92 = arith.constant 0 : index
    %c13 = arith.constant 13 : index
    %c0_93 = arith.constant 0 : index
    %89 = vector.load %arg7[%c0_92, %c13, %c0_93] : memref<8x16x48xbf16, #tpu.memory_space<vmem>>, vector<8x1x48xbf16>
    %90 = vector.shape_cast %89 : vector<8x1x48xbf16> to vector<8x48xbf16>
    %c13_94 = arith.constant 13 : index
    %c0_95 = arith.constant 0 : index
    %c0_96 = arith.constant 0 : index
    %91 = vector.load %arg4[%c13_94, %c0_95, %c0_96] : memref<16x48x32xbf16, #tpu.memory_space<vmem>>, vector<1x48x32xbf16>
    %92 = vector.shape_cast %91 : vector<1x48x32xbf16> to vector<48x32xbf16>
    %cst_97 = arith.constant dense<0.000000e+00> : vector<8x32xf32>
    %93 = tpu.matmul %90, %92, %cst_97 {dimension_numbers = #tpu.dot_dimension_numbers<[1], [0], [0], [1], [0, 0, 1, 1], [], []>} : vector<8x48xbf16>, vector<48x32xbf16>, vector<8x32xf32> -> vector<8x32xf32>
    %94 = arith.addf %88, %93 : vector<8x32xf32>
    %c0_98 = arith.constant 0 : index
    %c14 = arith.constant 14 : index
    %c0_99 = arith.constant 0 : index
    %95 = vector.load %arg7[%c0_98, %c14, %c0_99] : memref<8x16x48xbf16, #tpu.memory_space<vmem>>, vector<8x1x48xbf16>
    %96 = vector.shape_cast %95 : vector<8x1x48xbf16> to vector<8x48xbf16>
    %c14_100 = arith.constant 14 : index
    %c0_101 = arith.constant 0 : index
    %c0_102 = arith.constant 0 : index
    %97 = vector.load %arg4[%c14_100, %c0_101, %c0_102] : memref<16x48x32xbf16, #tpu.memory_space<vmem>>, vector<1x48x32xbf16>
    %98 = vector.shape_cast %97 : vector<1x48x32xbf16> to vector<48x32xbf16>
    %cst_103 = arith.constant dense<0.000000e+00> : vector<8x32xf32>
    %99 = tpu.matmul %96, %98, %cst_103 {dimension_numbers = #tpu.dot_dimension_numbers<[1], [0], [0], [1], [0, 0, 1, 1], [], []>} : vector<8x48xbf16>, vector<48x32xbf16>, vector<8x32xf32> -> vector<8x32xf32>
    %100 = arith.addf %94, %99 : vector<8x32xf32>
    %c0_104 = arith.constant 0 : index
    %c15 = arith.constant 15 : index
    %c0_105 = arith.constant 0 : index
    %101 = vector.load %arg7[%c0_104, %c15, %c0_105] : memref<8x16x48xbf16, #tpu.memory_space<vmem>>, vector<8x1x48xbf16>
    %102 = vector.shape_cast %101 : vector<8x1x48xbf16> to vector<8x48xbf16>
    %c15_106 = arith.constant 15 : index
    %c0_107 = arith.constant 0 : index
    %c0_108 = arith.constant 0 : index
    %103 = vector.load %arg4[%c15_106, %c0_107, %c0_108] : memref<16x48x32xbf16, #tpu.memory_space<vmem>>, vector<1x48x32xbf16>
    %104 = vector.shape_cast %103 : vector<1x48x32xbf16> to vector<48x32xbf16>
    %cst_109 = arith.constant dense<0.000000e+00> : vector<8x32xf32>
    %105 = tpu.matmul %102, %104, %cst_109 {dimension_numbers = #tpu.dot_dimension_numbers<[1], [0], [0], [1], [0, 0, 1, 1], [], []>} : vector<8x48xbf16>, vector<48x32xbf16>, vector<8x32xf32> -> vector<8x32xf32>
    %106 = arith.addf %100, %105 : vector<8x32xf32>
    %c0_110 = arith.constant 0 : index
    %c0_111 = arith.constant 0 : index
    %107 = vector.load %arg5[%c0_110, %c0_111] : memref<1x32xf32, #tpu.memory_space<vmem>>, vector<1x32xf32>
    %108 = vector.broadcast %107 : vector<1x32xf32> to vector<8x32xf32>
    %109 = arith.addf %106, %108 : vector<8x32xf32>
    %c0_112 = arith.constant 0 : index
    %c0_113 = arith.constant 0 : index
    %110 = vector.load %arg6[%c0_112, %c0_113] : memref<8x32xf32, #tpu.memory_space<vmem>>, vector<8x32xf32>
    tpu.vector_store %arg6[%c0_112, %c0_113], %109 {strides = array<i32>} : memref<8x32xf32, #tpu.memory_space<vmem>>, vector<8x32xf32>,
    return
  }
  func.func @transform_0(%arg0: i32) -> (i32, i32, i32) {
    %c0_i32 = arith.constant 0 : i32
    %c0_i32_0 = arith.constant 0 : i32
    %c0_i32_1 = arith.constant 0 : i32
    %c0_i32_2 = arith.constant 0 : i32
    return %c0_i32, %c0_i32_0, %c0_i32_1 : i32, i32, i32
  }
  func.func @transform_1(%arg0: i32) -> (i32, i32, i32) {
    %c0_i32 = arith.constant 0 : i32
    %c0_i32_0 = arith.constant 0 : i32
    %c0_i32_1 = arith.constant 0 : i32
    %c0_i32_2 = arith.constant 0 : i32
    return %c0_i32, %c0_i32_0, %c0_i32_1 : i32, i32, i32
  }
  func.func @transform_2(%arg0: i32) -> (i32, i32, i32) {
    %c0_i32 = arith.constant 0 : i32
    %c0_i32_0 = arith.constant 0 : i32
    %c0_i32_1 = arith.constant 0 : i32
    %c0_i32_2 = arith.constant 0 : i32
    return %c0_i32, %c0_i32_0, %c0_i32_1 : i32, i32, i32
  }
  func.func @transform_3(%arg0: i32) -> (i32, i32, i32) {
    %c0_i32 = arith.constant 0 : i32
    %c0_i32_0 = arith.constant 0 : i32
    %c0_i32_1 = arith.constant 0 : i32
    %c0_i32_2 = arith.constant 0 : i32
    return %c0_i32, %c0_i32_0, %c0_i32_1 : i32, i32, i32
  }
  func.func @transform_4(%arg0: i32) -> (i32, i32) {
    %c0_i32 = arith.constant 0 : i32
    %c0_i32_0 = arith.constant 0 : i32
    %c0_i32_1 = arith.constant 0 : i32
    return %c0_i32, %c0_i32_0 : i32, i32
  }
  func.func @transform_5(%arg0: i32) -> (i32, i32) {
    %c0_i32 = arith.constant 0 : i32
    %c0_i32_0 = arith.constant 0 : i32
    %c0_i32_1 = arith.constant 0 : i32
    return %c0_i32, %c0_i32_0 : i32, i32
  }
}

</mosaic_0001>

<bundles_post_ra>
// kernel: _compute_embeds.3
= control target key start
LH: loop header
LB: loop body
LE: loop exit
PB: predicated region body
PF: predicated region fallthrough
CT: control target
= control target key end

     0   :  { %v3519_v1 = vmov 0.0   ;;  %vm59_vm0 = vcmask 1043456   ;;  %vm3520_vm1 = vmmov 0   ;;  %vm55_vm2 = vcmask 195584   ;;  %s4340_s0 = inlined_call_operand.vmem [shape: bf16[1,24,72], index: 0, kind: input, shape index: {}]   ;;  %s4341_s1 = inlined_call_operand.vmem [shape: bf16[8,16,24], index: 1, kind: input, shape index: {}]   ;;  %s4342_s2 = inlined_call_operand.vmem [shape: bf16[8,72,48], index: 2, kind: input, shape index: {}]   ;;  %s4343_s3 = inlined_call_operand.vmem [shape: bf16[16,48,32], index: 3, kind: input, shape index: {}]   ;;  %s4344_s4 = inlined_call_operand.vmem [shape: f32[1,32], index: 4, kind: input, shape index: {}]   ;;  %s4345_s5 = inlined_call_operand.hbm [shape: f32[8,32], index: 5, kind: output, shape index: {}]  }
   0x1   :  { %v3397_v0 = vld [vmem:[%s4340_s0] sm:$0xff]   ;;  %3058 = vmatprep.subr.bf16.mxu0 %v3519_v1  ;;  %3066 = vmatprep.subr.bf16.mxu1 %v3519_v1  ;;  %v3398_v2 = vld [vmem:[%s4340_s0 + $0x8] ss:$0 sps:$4 sm:$0xff]   ;;  %v3401_v6 = vld [vmem:[%s4341_s1 + $0x10] sm:$0xff]  }
   0x2   :  { %3059 = vmatpush3.bf16.msra.mxu0 %v3397_v0  ;;  %3067 = vmatpush3.bf16.msra.mxu1 %v3397_v0  ;;  %v61_v3 = vsel %vm59_vm0, %v3398_v2, 0  ;;  %v3399_v4 = vld [vmem:[%s4341_s1] sm:$0xff]   ;;  %v3400_v5 = vld [vmem:[%s4341_s1 + $0x8] sm:$0xff]   ;;  %v3402_v7 = vld [vmem:[%s4341_s1 + $0x18] sm:$0xff]  }
   0x3   :  { %3060 = vmatprep.subr.bf16.mxu0 %v3519_v1  ;;  %3068 = vmatprep.subr.bf16.mxu1 %v3519_v1  ;;  %v3403_v8 = vld [vmem:[%s4341_s1 + $0x20] sm:$0xff]   ;;  %v3404_v9 = vld [vmem:[%s4341_s1 + $0x28] sm:$0xff]   ;;  %v3405_v10 = vld [vmem:[%s4341_s1 + $0x30] sm:$0xff]  }
   0x4   :  { %3062 = vmatprep.mubr.msk.bf16.mxu0 %vm3520_vm1, %v3519_v1  ;;  %3070 = vmatprep.mubr.msk.bf16.mxu1 %vm3520_vm1, %v3519_v1  ;;  %v3406_v11 = vld [vmem:[%s4341_s1 + $0x38] sm:$0xff]   ;;  %v3407_v12 = vld [vmem:[%s4342_s2] sm:$0xff]   ;;  %v3409_v14 = vld [vmem:[%s4342_s2 + $0x8] sm:$0xff]  }
   0x5   :  { %v3408_v13 = vld [vmem:[%s4342_s2 + $0x24] sm:$0xff]   ;;  %v3410_v15 = vld [vmem:[%s4342_s2 + $0x2c] sm:$0xff]   ;;  %v3412_v17 = vld [vmem:[%s4342_s2 + $0x34] sm:$0xff]  }
   0x6   :  { %3061 = vmatpush3.bf16.msra.mxu0 %v61_v3  ;;  %3069 = vmatpush3.bf16.msra.mxu1 %v61_v3  ;;  %v3411_v16 = vld [vmem:[%s4342_s2 + $0x10] sm:$0xff]   ;;  %v3413_v18 = vld [vmem:[%s4342_s2 + $0x18] sm:$0xff]  }
   0x7   :  { %3074 = vmatprep.subr.bf16.mxu0 %v3519_v1  ;;  %3082 = vmatprep.subr.bf16.mxu1 %v3519_v1  ;;  %v3414_v19 = vld [vmem:[%s4342_s2 + $0x3c] sm:$0xff]  }
   0x9   :  { %3063 = vmatmul.mubr.msk.bf16.vlgmr.msra.gmra.mrb[0].mxu0 %vm55_vm2, %v3399_v4  ;;  %3071 = vmatmul.mubr.msk.bf16.vlgmr.msra.gmra.mrb[0].mxu1 %vm55_vm2, %v3400_v5 }
   0xa   :  { %3075 = vmatpush3.bf16.msra.mxu0 %v3397_v0  ;;  %3083 = vmatpush3.bf16.msra.mxu1 %v3397_v0 }
   0xb   :  { %3076 = vmatprep.subr.bf16.mxu0 %v3519_v1  ;;  %3084 = vmatprep.subr.bf16.mxu1 %v3519_v1 }
   0xc   :  { %3078 = vmatprep.mubr.msk.bf16.mxu0 %vm3520_vm1, %v3519_v1  ;;  %3086 = vmatprep.mubr.msk.bf16.mxu1 %vm3520_vm1, %v3519_v1 }
   0xe   :  { %3077 = vmatpush3.bf16.msra.mxu0 %v61_v3  ;;  %3085 = vmatpush3.bf16.msra.mxu1 %v61_v3 }
   0xf   :  { %3090 = vmatprep.subr.bf16.mxu0 %v3519_v1  ;;  %3098 = vmatprep.subr.bf16.mxu1 %v3519_v1 }
  0x11   :  { %3079 = vmatmul.mubr.msk.bf16.vlgmr.msra.gmra.mrb[4].mxu0 %vm55_vm2, %v3401_v6  ;;  %3087 = vmatmul.mubr.msk.bf16.vlgmr.msra.gmra.mrb[4].mxu1 %vm55_vm2, %v3402_v7 }
  0x12   :  { %3091 = vmatpush3.bf16.msra.mxu0 %v3397_v0  ;;  %3099 = vmatpush3.bf16.msra.mxu1 %v3397_v0 }
  0x13   :  { %3092 = vmatprep.subr.bf16.mxu0 %v3519_v1  ;;  %3100 = vmatprep.subr.bf16.mxu1 %v3519_v1 }
  0x14   :  { %3094 = vmatprep.mubr.msk.bf16.mxu0 %vm3520_vm1, %v3519_v1  ;;  %3102 = vmatprep.mubr.msk.bf16.mxu1 %vm3520_vm1, %v3519_v1 }
  0x16   :  { %3093 = vmatpush3.bf16.msra.mxu0 %v61_v3  ;;  %3101 = vmatpush3.bf16.msra.mxu1 %v61_v3 }
  0x17   :  { %3106 = vmatprep.subr.bf16.mxu0 %v3519_v1  ;;  %3114 = vmatprep.subr.bf16.mxu1 %v3519_v1 }
  0x19   :  { %3095 = vmatmul.mubr.msk.bf16.vlgmr.msra.gmra.mrb[8].mxu0 %vm55_vm2, %v3403_v8  ;;  %3103 = vmatmul.mubr.msk.bf16.vlgmr.msra.gmra.mrb[8].mxu1 %vm55_vm2, %v3404_v9 }
  0x1a   :  { %3107 = vmatpush3.bf16.msra.mxu0 %v3397_v0  ;;  %3115 = vmatpush3.bf16.msra.mxu1 %v3397_v0 }
  0x1b   :  { %3108 = vmatprep.subr.bf16.mxu0 %v3519_v1  ;;  %3116 = vmatprep.subr.bf16.mxu1 %v3519_v1 }
  0x1c   :  { %3110 = vmatprep.mubr.msk.bf16.mxu0 %vm3520_vm1, %v3519_v1  ;;  %3118 = vmatprep.mubr.msk.bf16.mxu1 %vm3520_vm1, %v3519_v1 }
  0x1e   :  { %3109 = vmatpush3.bf16.msra.mxu0 %v61_v3  ;;  %3117 = vmatpush3.bf16.msra.mxu1 %v61_v3 }
  0x1f   :  { %3122 = vmatprep.subr.bf16.mxu0 %v3519_v1  ;;  %3136 = vmatprep.subr.bf16.mxu1 %v3519_v1 }
  0x21   :  { %3111 = vmatmul.mubr.msk.bf16.vlgmr.msra.gmra.mrb[12].mxu0 %vm55_vm2, %v3405_v10  ;;  %3119 = vmatmul.mubr.msk.bf16.vlgmr.msra.gmra.mrb[12].mxu1 %vm55_vm2, %v3406_v11 }
  0x22   :  { %3123 = vmatpush3.bf16.msra.mxu0 %v3407_v12  ;;  %3137 = vmatpush3.bf16.msra.mxu1 %v3408_v13 }
  0x23   :  { %3124 = vmatprep.subr.bf16.mxu0 %v3519_v1  ;;  %3138 = vmatprep.subr.bf16.mxu1 %v3519_v1 }
  0x24   :  { %3132 = vmatprep.mubr.msk.bf16.mxu0 %vm3520_vm1, %v3519_v1  ;;  %3146 = vmatprep.mubr.msk.bf16.mxu1 %vm3520_vm1, %v3519_v1 }
  0x26   :  { %3125 = vmatpush3.bf16.msra.mxu0 %v3409_v14  ;;  %3139 = vmatpush3.bf16.msra.mxu1 %v3410_v15 }
  0x27   :  { %3126 = vmatprep.subr.bf16.mxu0 %v3519_v1  ;;  %3140 = vmatprep.subr.bf16.mxu1 %v3519_v1 }
  0x2a   :  { %3127 = vmatpush3.bf16.msra.mxu0 %v3411_v16  ;;  %3141 = vmatpush3.bf16.msra.mxu1 %v3412_v17 }
  0x2b   :  { %3128 = vmatprep.subr.bf16.mxu0 %v3519_v1  ;;  %3142 = vmatprep.subr.bf16.mxu1 %v3519_v1 }
  0x2e   :  { %3129 = vmatpush3.bf16.msra.mxu0 %v3413_v18  ;;  %3143 = vmatpush3.bf16.msra.mxu1 %v3414_v19 }
  0x2f   :  { %3130 = vmatprep.subr.bf16.mxu0 %v3519_v1  ;;  %3144 = vmatprep.subr.bf16.mxu1 %v3519_v1 }
  0x30   :  { %10 = vsyncpa [#allocation4], 0  ;;  %v3415_v20 = vld [vmem:[%s4342_s2 + $0x20] ss:$0 sps:$4 sm:$0xff]   ;;  %v3416_v21 = vld [vmem:[%s4342_s2 + $0x44] ss:$0 sps:$4 sm:$0xff]  }
  0x31   :  { %v559_v22 = vsel %vm59_vm0, %v3415_v20, 0  ;;  %v633_v23 = vsel %vm59_vm0, %v3416_v21, 0  ;;  %vm554_vm3 = vcmask 588800   ;;  %v3417_v30 = vld [vmem:[%s4342_s2 + $0x48] sm:$0xff]   ;;  %v3419_v36 = vld [vmem:[%s4342_s2 + $0x50] sm:$0xff]   ;;  %v3421_v42 = vld [vmem:[%s4342_s2 + $0x58] sm:$0xff]  }
  0x32   :  { %3131 = vmatpush3.bf16.msra.mxu0 %v559_v22  ;;  %3145 = vmatpush3.bf16.msra.mxu1 %v633_v23  ;;  %v3418_v31 = vld [vmem:[%s4342_s2 + $0x6c] sm:$0xff]   ;;  %v3420_v37 = vld [vmem:[%s4342_s2 + $0x74] sm:$0xff]   ;;  %v3422_v43 = vld [vmem:[%s4342_s2 + $0x7c] sm:$0xff]   ;;  %vm1128_vm4 = vcmask 392192   ;;  %vm1175_vm5 = vcmask 1041409   ;;  %vm1178_vm6 = vcmask 1042434  }
  0x33   :  { %3150 = vmatprep.subr.bf16.mxu0 %v3519_v1  ;;  %3164 = vmatprep.subr.bf16.mxu1 %v3519_v1  ;;  %v3423_v50 = vld [vmem:[%s4342_s2 + $0x60] sm:$0xff]   ;;  %v3425_v52 = vld [vmem:[%s4342_s2 + $0x68] ss:$0 sps:$4 sm:$0xff]   ;;  %v3426_v53 = vld [vmem:[%s4342_s2 + $0x8c] ss:$0 sps:$4 sm:$0xff]   ;;  %vm1181_vm7 = vcmask 1043459  }
  0x34   :  { %v3424_v51 = vld [vmem:[%s4342_s2 + $0x84] sm:$0xff]   ;;  %v707_v60 = vsel %vm59_vm0, %v3425_v52, 0  ;;  %v781_v61 = vsel %vm59_vm0, %v3426_v53, 0  ;;  %v3427_v3 = vld [vmem:[%s4342_s2 + $0x90] sm:$0xff]   ;;  %v3429_v9 = vld [vmem:[%s4342_s2 + $0x98] sm:$0xff]   ;;  %vm1184_vm8 = vcmask 1044484  }
  0x35   :  { %v3428_v4 = vld [vmem:[%s4342_s2 + $0xb4] sm:$0xff]   ;;  %v3430_v10 = vld [vmem:[%s4342_s2 + $0xbc] sm:$0xff]   ;;  %v3432_v18 = vld [vmem:[%s4342_s2 + $0xc4] sm:$0xff]   ;;  %vm1187_vm9 = vcmask 1045509   ;;  %vm1193_vm10 = vcmask 1047559   ;;  %vm1190_vm11 = vcmask 1046534  }
  0x36   :  { %v3431_v17 = vld [vmem:[%s4342_s2 + $0xa0] sm:$0xff]   ;;  %v3433_v19 = vld [vmem:[%s4342_s2 + $0xa8] sm:$0xff]   ;;  %v3435_v21 = vld [vmem:[%s4342_s2 + $0xb0] ss:$0 sps:$4 sm:$0xff]   ;;  %s3521_s22 = smov [#allocation3]   ;;  %vm2685_vm12 = vcmask 261120  }
  0x37   :  { %v3434_v20 = vld [vmem:[%s4342_s2 + $0xcc] sm:$0xff]   ;;  %v3436_v22 = vld [vmem:[%s4342_s2 + $0xd4] ss:$0 sps:$4 sm:$0xff]   ;;  %v855_v23 = vsel %vm59_vm0, %v3435_v21, 0  ;;  %s2693_s23 = sshll.u32 %s3521_s22, 4  ;;  %s2694_s23 = int_to_ptr.vmem [resolvable:$true] %s2693_s23 }
  0x38   :  { %s3495_s0 = scalar_lea.vmem %s2694_s23, 128  ;;  %p3500_p1 = scmp.lt.s32.totalorder %s2694_s23, %s2694_s23 }
  0x39   :  { %p3496_p0 = scmp.ne.s32.totalorder %s2694_s23, %s3495_s0  ;;  %p3501_p2 = scmp.lt.s32.totalorder %s3495_s0, %s3495_s0 }
  0x3b   :  { %p3502_p3 = por %p3501_p2, %p3500_p1 }
  0x3d   :  { %p3503_p4 = pnand %p3502_p3, %p3496_p0 }
  0xdc   :  { %v97_v24 = vpop.f32.mrb[0].mxu0  ;;  %v146_v25 = vpop.f32.mrb[0].mxu1 }
  0xdd   :  { %v3064_v26 = vpop.f32.mrb[1].mxu0  ;;  %v3072_v27 = vpop.f32.mrb[1].mxu1 }
  0xde   :  { %v100_v28 = vpop.f32.mrb[2].mxu0  ;;  %v149_v29 = vpop.f32.mrb[2].mxu1  ;;  %v3438_v26 = vld [vmem:[%s4342_s2 + $0xfc] sm:$0xff]  }
  0xdf   :  { %v447_v32 = vpack.c.bf16 %v100_v28, %v97_v24  ;;  %v448_v33 = vpack.c.bf16 %v149_v29, %v146_v25  ;;  %v3065_v34 = vpop.f32.mrb[3].mxu0  ;;  %v3073_v35 = vpop.f32.mrb[3].mxu1  ;;  %v929_v24 = vsel %vm59_vm0, %v3436_v22, 0  ;;  %v3437_v25 = vld [vmem:[%s4342_s2 + $0xd8] sm:$0xff]   ;;  %v3439_v27 = vld [vmem:[%s4342_s2 + $0xe0] sm:$0xff]   ;;  %v3441_v29 = vld [vmem:[%s4342_s2 + $0xe8] sm:$0xff]  }
  0xe0   :  { %v3440_v28 = vld [vmem:[%s4342_s2 + $0x104] sm:$0xff]   ;;  %v3446_v34 = vld [vmem:[%s4342_s2 + $0x11c] ss:$0 sps:$4 sm:$0xff]  }
  0xe1   :  { %3133 = vmatmul.mubr.msk.bf16.vlgmr.msra.gmra.mrb[16].mxu0 %vm554_vm3, %v447_v32  ;;  %3147 = vmatmul.mubr.msk.bf16.vlgmr.msra.gmra.mrb[16].mxu1 %vm554_vm3, %v448_v33  ;;  %v3444_v32 = vld [vmem:[%s4342_s2 + $0x114] sm:$0xff]  }
  0xe2   :  { %3151 = vmatpush3.bf16.msra.mxu0 %v3417_v30  ;;  %3165 = vmatpush3.bf16.msra.mxu1 %v3418_v31  ;;  %v3442_v30 = vld [vmem:[%s4342_s2 + $0x10c] sm:$0xff]   ;;  %v3445_v33 = vld [vmem:[%s4342_s2 + $0xf8] ss:$0 sps:$4 sm:$0xff]  }
  0xe3   :  { %3152 = vmatprep.subr.bf16.mxu0 %v3519_v1  ;;  %3166 = vmatprep.subr.bf16.mxu1 %v3519_v1  ;;  %v3443_v31 = vld [vmem:[%s4342_s2 + $0xf0] sm:$0xff]   ;;  %v1003_v35 = vsel %vm59_vm0, %v3445_v33, 0 }
  0xe4   :  { %v195_v38 = vpop.f32.mrb[4].mxu0  ;;  %v244_v39 = vpop.f32.mrb[4].mxu1  ;;  %3160 = vmatprep.mubr.msk.bf16.mxu0 %vm3520_vm1, %v3519_v1  ;;  %3174 = vmatprep.mubr.msk.bf16.mxu1 %vm3520_vm1, %v3519_v1 }
  0xe5   :  { %v3080_v40 = vpop.f32.mrb[5].mxu0  ;;  %v3088_v41 = vpop.f32.mrb[5].mxu1 }
  0xe6   :  { %3153 = vmatpush3.bf16.msra.mxu0 %v3419_v36  ;;  %3167 = vmatpush3.bf16.msra.mxu1 %v3420_v37  ;;  %v198_v44 = vpop.f32.mrb[6].mxu0  ;;  %v247_v45 = vpop.f32.mrb[6].mxu1  ;;  %v1077_v36 = vsel %vm59_vm0, %v3446_v34, 0  ;;  %v3447_v37 = vld [vmem:[%s4343_s3 + $0x18] sm:$0xff]   ;;  %v3450_v40 = vld [vmem:[%s4343_s3 + $0x8] sm:$0xff]  }
  0xe7   :  { %3154 = vmatprep.subr.bf16.mxu0 %v3519_v1  ;;  %3168 = vmatprep.subr.bf16.mxu1 %v3519_v1  ;;  %v449_v46 = vpack.c.bf16 %v198_v44, %v195_v38  ;;  %v3081_v47 = vpop.f32.mrb[7].mxu0  ;;  %v450_v48 = vpack.c.bf16 %v247_v45, %v244_v39  ;;  %v3089_v49 = vpop.f32.mrb[7].mxu1  ;;  %v3448_v38 = vld [vmem:[%s4343_s3] sm:$0xff]   ;;  %v3451_v41 = vld [vmem:[%s4343_s3 + $0x28] sm:$0xff]  }
  0xe8   :  { %v3449_v39 = vld [vmem:[%s4343_s3 + $0x20] sm:$0xff]  }
  0xea   :  { %3155 = vmatpush3.bf16.msra.mxu0 %v3421_v42  ;;  %3169 = vmatpush3.bf16.msra.mxu1 %v3422_v43  ;;  %v3452_v42 = vld [vmem:[%s4343_s3 + $0x10] sm:$0xff]  }
  0xeb   :  { %3156 = vmatprep.subr.bf16.mxu0 %v3519_v1  ;;  %3170 = vmatprep.subr.bf16.mxu1 %v3519_v1 }
  0xec   :  { %v3713_v54 = vpop.f32.mrb[8].mxu0  ;;  %v3715_v55 = vpop.f32.mrb[8].mxu1 }
  0xed   :  { %v3096_v56 = vpop.f32.mrb[9].mxu0  ;;  %v3104_v57 = vpop.f32.mrb[9].mxu1 }
  0xee   :  { %3157 = vmatpush3.bf16.msra.mxu0 %v3423_v50  ;;  %3171 = vmatpush3.bf16.msra.mxu1 %v3424_v51  ;;  %v3717_v58 = vpop.f32.mrb[10].mxu0  ;;  %v3719_v59 = vpop.f32.mrb[10].mxu1 }
  0xef   :  { %3158 = vmatprep.subr.bf16.mxu0 %v3519_v1  ;;  %3172 = vmatprep.subr.bf16.mxu1 %v3519_v1  ;;  %v451_v62 = vpack.c.bf16 %v3717_v58, %v3713_v54  ;;  %v3097_v63 = vpop.f32.mrb[11].mxu0  ;;  %v452_v0 = vpack.c.bf16 %v3719_v59, %v3715_v55  ;;  %v3105_v2 = vpop.f32.mrb[11].mxu1 }
  0xf2   :  { %3159 = vmatpush3.bf16.msra.mxu0 %v707_v60  ;;  %3173 = vmatpush3.bf16.msra.mxu1 %v781_v61 }
  0xf3   :  { %3178 = vmatprep.subr.bf16.mxu0 %v3519_v1  ;;  %3192 = vmatprep.subr.bf16.mxu1 %v3519_v1 }
  0xf4   :  { %v3737_v5 = vpop.f32.mrb[12].mxu0  ;;  %v3739_v6 = vpop.f32.mrb[12].mxu1 }
  0xf5   :  { %3161 = vmatmul.mubr.msk.bf16.vlgmr.msra.gmra.mrb[20].mxu0 %vm554_vm3, %v449_v46  ;;  %3175 = vmatmul.mubr.msk.bf16.vlgmr.msra.gmra.mrb[20].mxu1 %vm554_vm3, %v450_v48  ;;  %v3112_v7 = vpop.f32.mrb[13].mxu0  ;;  %v3120_v8 = vpop.f32.mrb[13].mxu1 }
  0xf6   :  { %3179 = vmatpush3.bf16.msra.mxu0 %v3427_v3  ;;  %3193 = vmatpush3.bf16.msra.mxu1 %v3428_v4  ;;  %v3749_v11 = vpop.f32.mrb[14].mxu0  ;;  %v3751_v12 = vpop.f32.mrb[14].mxu1 }
  0xf7   :  { %3180 = vmatprep.subr.bf16.mxu0 %v3519_v1  ;;  %3194 = vmatprep.subr.bf16.mxu1 %v3519_v1  ;;  %v453_v13 = vpack.c.bf16 %v3749_v11, %v3737_v5  ;;  %v3113_v14 = vpop.f32.mrb[15].mxu0  ;;  %v454_v15 = vpack.c.bf16 %v3751_v12, %v3739_v6  ;;  %v3121_v16 = vpop.f32.mrb[15].mxu1 }
  0xf8   :  { %3188 = vmatprep.mubr.msk.bf16.mxu0 %vm3520_vm1, %v3519_v1  ;;  %3202 = vmatprep.mubr.msk.bf16.mxu1 %vm3520_vm1, %v3519_v1 }
  0xfa   :  { %3181 = vmatpush3.bf16.msra.mxu0 %v3429_v9  ;;  %3195 = vmatpush3.bf16.msra.mxu1 %v3430_v10 }
  0xfb   :  { %3182 = vmatprep.subr.bf16.mxu0 %v3519_v1  ;;  %3196 = vmatprep.subr.bf16.mxu1 %v3519_v1 }
  0xfe   :  { %3183 = vmatpush3.bf16.msra.mxu0 %v3431_v17  ;;  %3197 = vmatpush3.bf16.msra.mxu1 %v3432_v18 }
  0xff   :  { %3184 = vmatprep.subr.bf16.mxu0 %v3519_v1  ;;  %3198 = vmatprep.subr.bf16.mxu1 %v3519_v1 }
 0x102   :  { %3185 = vmatpush3.bf16.msra.mxu0 %v3433_v19  ;;  %3199 = vmatpush3.bf16.msra.mxu1 %v3434_v20 }
 0x103   :  { %3186 = vmatprep.subr.bf16.mxu0 %v3519_v1  ;;  %3200 = vmatprep.subr.bf16.mxu1 %v3519_v1 }
 0x106   :  { %3187 = vmatpush3.bf16.msra.mxu0 %v855_v23  ;;  %3201 = vmatpush3.bf16.msra.mxu1 %v929_v24 }
 0x107   :  { %3206 = vmatprep.subr.bf16.mxu0 %v3519_v1  ;;  %3220 = vmatprep.subr.bf16.mxu1 %v3519_v1 }
 0x109   :  { %3189 = vmatmul.mubr.msk.bf16.vlgmr.msra.gmra.mrb[24].mxu0 %vm554_vm3, %v451_v62  ;;  %3203 = vmatmul.mubr.msk.bf16.vlgmr.msra.gmra.mrb[24].mxu1 %vm554_vm3, %v452_v0 }
 0x10a   :  { %3207 = vmatpush3.bf16.msra.mxu0 %v3437_v25  ;;  %3221 = vmatpush3.bf16.msra.mxu1 %v3438_v26 }
 0x10b   :  { %3208 = vmatprep.subr.bf16.mxu0 %v3519_v1  ;;  %3222 = vmatprep.subr.bf16.mxu1 %v3519_v1 }
 0x10c   :  { %3216 = vmatprep.mubr.msk.bf16.mxu0 %vm3520_vm1, %v3519_v1  ;;  %3230 = vmatprep.mubr.msk.bf16.mxu1 %vm3520_vm1, %v3519_v1 }
 0x10e   :  { %3209 = vmatpush3.bf16.msra.mxu0 %v3439_v27  ;;  %3223 = vmatpush3.bf16.msra.mxu1 %v3440_v28 }
 0x10f   :  { %3210 = vmatprep.subr.bf16.mxu0 %v3519_v1  ;;  %3224 = vmatprep.subr.bf16.mxu1 %v3519_v1 }
 0x112   :  { %3211 = vmatpush3.bf16.msra.mxu0 %v3441_v29  ;;  %3225 = vmatpush3.bf16.msra.mxu1 %v3442_v30 }
 0x113   :  { %3212 = vmatprep.subr.bf16.mxu0 %v3519_v1  ;;  %3226 = vmatprep.subr.bf16.mxu1 %v3519_v1 }
 0x116   :  { %3213 = vmatpush3.bf16.msra.mxu0 %v3443_v31  ;;  %3227 = vmatpush3.bf16.msra.mxu1 %v3444_v32 }
 0x117   :  { %3214 = vmatprep.subr.bf16.mxu0 %v3519_v1  ;;  %3228 = vmatprep.subr.bf16.mxu1 %v3519_v1 }
 0x11a   :  { %3215 = vmatpush3.bf16.msra.mxu0 %v1003_v35  ;;  %3229 = vmatpush3.bf16.msra.mxu1 %v1077_v36 }
 0x11b   :  { %3234 = vmatprep.subr.bf16.mxu0 %v3519_v1  ;;  %3244 = vmatprep.subr.bf16.mxu1 %v3519_v1 }
 0x11d   :  { %3217 = vmatmul.mubr.msk.bf16.vlgmr.msra.gmra.mrb[28].mxu0 %vm554_vm3, %v453_v13  ;;  %3231 = vmatmul.mubr.msk.bf16.vlgmr.msra.gmra.mrb[28].mxu1 %vm554_vm3, %v454_v15 }
 0x11e   :  { %3240 = vmatprep.mubr.msk.bf16.mxu0 %vm3520_vm1, %v3519_v1  ;;  %3250 = vmatprep.mubr.msk.bf16.mxu1 %vm3520_vm1, %v3519_v1 }
 0x11f   :  { %3235 = vmatpush3.bf16.msra.mxu0 %v3447_v37  ;;  %3245 = vmatpush3.bf16.msra.mxu1 %v3448_v38 }
 0x120   :  { %3236 = vmatprep.subr.bf16.mxu0 %v3519_v1  ;;  %3246 = vmatprep.subr.bf16.mxu1 %v3519_v1 }
 0x123   :  { %3237 = vmatpush3.bf16.msra.mxu0 %v3449_v39  ;;  %3247 = vmatpush3.bf16.msra.mxu1 %v3450_v40 }
 0x124   :  { %3238 = vmatprep.subr.bf16.mxu0 %v3519_v1  ;;  %3248 = vmatprep.subr.bf16.mxu1 %v3519_v1 }
 0x127   :  { %3239 = vmatpush3.bf16.msra.mxu0 %v3451_v41  ;;  %3249 = vmatpush3.bf16.msra.mxu1 %v3452_v42 }
 0x128   :  { %3254 = vmatprep.subr.bf16.mxu0 %v3519_v1  ;;  %3264 = vmatprep.subr.bf16.mxu1 %v3519_v1 }
 0x1b4   :  { %v595_v43 = vpop.f32.mrb[16].mxu0  ;;  %v669_v44 = vpop.f32.mrb[16].mxu1 }
 0x1b5   :  { %v3134_v45 = vpop.f32.mrb[17].mxu0  ;;  %v3148_v46 = vpop.f32.mrb[17].mxu1 }
 0x1b6   :  { %v598_v47 = vpop.f32.mrb[18].mxu0  ;;  %v672_v48 = vpop.f32.mrb[18].mxu1 }
 0x1b7   :  { %v1120_v49 = vpack.c.bf16 %v598_v47, %v595_v43  ;;  %v1121_v50 = vpack.c.bf16 %v672_v48, %v669_v44  ;;  %v3135_v51 = vpop.f32.mrb[19].mxu0  ;;  %v3149_v52 = vpop.f32.mrb[19].mxu1 }
 0x1b9   :  { %1129 = vst.msk [vmem:[#allocation2] sm:$0xff] %vm1128_vm4, %v1120_v49  ;;  %1130 = vst.msk [vmem:[#allocation2 + $0x8] sm:$0xff] %vm1128_vm4, %v1121_v50 }
 0x1c0   :  { %v2293_v63 = vld [vmem:[#allocation2] sm:$0x40]  ;;  %v2294_v0 = vld [vmem:[#allocation2 + $0x8] sm:$0x40]  ;;  %v2485_v4 = vld [vmem:[#allocation2] sm:$0x80] }
 0x1c1   :  { %v2316_v2 = vunpack.c.h.b16 %v2293_v63  ;;  %v2317_v3 = vunpack.c.h.b16 %v2294_v0  ;;  %v2486_v5 = vld [vmem:[#allocation2 + $0x8] sm:$0x80]  ;;  %v2508_v10 = vunpack.c.h.b16 %v2485_v4  ;;  %v1137_v40 = vld [vmem:[#allocation2] sm:$0x1]  ;;  %v1138_v45 = vld [vmem:[#allocation2 + $0x8] sm:$0x1] }
 0x1c2   :  { %v2509_v11 = vunpack.c.h.b16 %v2486_v5  ;;  %v1333_v46 = vld [vmem:[#allocation2] sm:$0x2]  ;;  %v1334_v51 = vld [vmem:[#allocation2 + $0x8] sm:$0x2]  ;;  %v1525_v52 = vld [vmem:[#allocation2] sm:$0x4] }
 0x1c3   :  { %v2324_v14 = vrot.slane %v2316_v2, 4  ;;  %v2325_v15 = vrot.slane %v2317_v3, 3  ;;  %v2408_v20 = vrot.slane %v2316_v2, 5  ;;  %v2409_v21 = vrot.slane %v2317_v3, 4 }
 0x1c4   :  { %v2516_v26 = vrot.slane %v2508_v10, 6  ;;  %v2517_v27 = vrot.slane %v2509_v11, 5  ;;  %v2600_v28 = vrot.slane %v2508_v10, 7  ;;  %v2601_v32 = vrot.slane %v2509_v11, 6 }
 0x1c5   :  { %v2326_v33 = vsel %vm1175_vm5, %v2325_v15, %v2324_v14  ;;  %v2410_v34 = vsel %vm1175_vm5, %v2409_v21, %v2408_v20  ;;  %v1357_v0 = vunpack.c.l.b16 %v1334_v51  ;;  %v1548_v2 = vunpack.c.l.b16 %v1525_v52  ;;  %v3909_v21 = vld [vmem:[#allocation2] sm:$0x8] }
 0x1c6   :  { %v2518_v39 = vsel %vm1175_vm5, %v2517_v27, %v2516_v26  ;;  %v2602_v49 = vsel %vm1175_vm5, %v2601_v32, %v2600_v28 }
 0x1c7   :  { %v3903_v14 = vrot.slane %v1548_v2, 4  ;;  %v3907_v20 = vrot.slane %v1548_v2, 5 }
 0x1c8   :  { %v743_v53 = vpop.f32.mrb[20].mxu0  ;;  %v817_v54 = vpop.f32.mrb[20].mxu1 }
 0x1c9   :  { %v3162_v55 = vpop.f32.mrb[21].mxu0  ;;  %v3176_v56 = vpop.f32.mrb[21].mxu1 }
 0x1ca   :  { %v746_v57 = vpop.f32.mrb[22].mxu0  ;;  %v820_v58 = vpop.f32.mrb[22].mxu1 }
 0x1cb   :  { %v1122_v59 = vpack.c.bf16 %v746_v57, %v743_v53  ;;  %v1123_v60 = vpack.c.bf16 %v820_v58, %v817_v54  ;;  %v3163_v61 = vpop.f32.mrb[23].mxu0  ;;  %v3177_v62 = vpop.f32.mrb[23].mxu1  ;;  %v1526_v58 = vld [vmem:[#allocation2 + $0x8] sm:$0x4] }
 0x1cc   :  { %v1167_v61 = vunpack.c.l.b16 %v1138_v45  ;;  %v1356_v62 = vunpack.c.l.b16 %v1333_v46  ;;  %v1549_v5 = vunpack.c.l.b16 %v1526_v58 }
 0x1cd   :  { %1131 = vst.msk [vmem:[#allocation2 + $0x10] sm:$0xff] %vm1128_vm4, %v1122_v59  ;;  %1132 = vst.msk [vmem:[#allocation2 + $0x18] sm:$0xff] %vm1128_vm4, %v1123_v60  ;;  %v1166_v60 = vunpack.c.l.b16 %v1137_v40 }
 0x1d4   :  { %v2295_v22 = vld [vmem:[#allocation2 + $0x10] sm:$0x40]  ;;  %v2296_v23 = vld [vmem:[#allocation2 + $0x18] sm:$0x40]  ;;  %v2487_v24 = vld [vmem:[#allocation2 + $0x10] sm:$0x80] }
 0x1d5   :  { %v2488_v25 = vld [vmem:[#allocation2 + $0x18] sm:$0x80]  ;;  %v2318_v29 = vunpack.c.h.b16 %v2295_v22  ;;  %v2319_v30 = vunpack.c.h.b16 %v2296_v23  ;;  %v2510_v31 = vunpack.c.h.b16 %v2487_v24  ;;  %v1139_v57 = vld [vmem:[#allocation2 + $0x10] sm:$0x1]  ;;  %v1140_v3 = vld [vmem:[#allocation2 + $0x18] sm:$0x1] }
 0x1d6   :  { %v2511_v35 = vunpack.c.h.b16 %v2488_v25  ;;  %v1168_v4 = vunpack.c.l.b16 %v1139_v57  ;;  %v1169_v10 = vunpack.c.l.b16 %v1140_v3  ;;  %v3901_v11 = vld [vmem:[#allocation2 + $0x10] sm:$0x2]  ;;  %v3911_v25 = vld [vmem:[#allocation2 + $0x18] sm:$0x2]  ;;  %v3916_v32 = vld [vmem:[#allocation2 + $0x10] sm:$0x4] }
 0x1d7   :  { %v2327_v36 = vrot.slane %v2318_v29, 2  ;;  %v2329_v37 = vrot.slane %v2319_v30, 1  ;;  %v2411_v38 = vrot.slane %v2318_v29, 3  ;;  %v2413_v41 = vrot.slane %v2319_v30, 2 }
 0x1d8   :  { %v2519_v42 = vrot.slane %v2510_v31, 4  ;;  %v2521_v43 = vrot.slane %v2511_v35, 3  ;;  %v2603_v44 = vrot.slane %v2510_v31, 5  ;;  %v2605_v50 = vrot.slane %v2511_v35, 4 }
 0x1d9   :  { %v2328_v47 = vsel %vm1178_vm6, %v2327_v36, %v2326_v33  ;;  %v2412_v48 = vsel %vm1178_vm6, %v2411_v38, %v2410_v34  ;;  %v1358_v31 = vunpack.c.l.b16 %v3901_v11  ;;  %v3918_v33 = vld [vmem:[#allocation2 + $0x18] sm:$0x4]  ;;  %v1261_v40 = vrot.slane %v1169_v10, 5 }
 0x1da   :  { %v3888_v53 = vsel %vm1181_vm7, %v2329_v37, %v2328_v47  ;;  %v3891_v54 = vsel %vm1181_vm7, %v2413_v41, %v2412_v48  ;;  %v2520_v55 = vsel %vm1178_vm6, %v2519_v42, %v2518_v39  ;;  %v2604_v56 = vsel %vm1178_vm6, %v2603_v44, %v2602_v49 }
 0x1db   :  { %v3896_v59 = vsel %vm1181_vm7, %v2521_v43, %v2520_v55  ;;  %v3899_v63 = vsel %vm1181_vm7, %v2605_v50, %v2604_v56  ;;  %v1180_v39 = vrot.slane %v1169_v10, 6  ;;  %v3926_v48 = vrot.slane %v1549_v5, 4 }
 0x1dc   :  { %v891_v6 = vpop.f32.mrb[24].mxu0  ;;  %v965_v7 = vpop.f32.mrb[24].mxu1  ;;  %v1740_v49 = vunpack.c.l.b16 %v3909_v21  ;;  %v1359_v55 = vunpack.c.l.b16 %v3911_v25  ;;  %v1550_v56 = vunpack.c.l.b16 %v3916_v32  ;;  %v1551_v57 = vunpack.c.l.b16 %v3918_v33  ;;  %v3455_v25 = vld [vmem:[%s4343_s3 + $0x38] sm:$0xff]  }
 0x1dd   :  { %v3190_v8 = vpop.f32.mrb[25].mxu0  ;;  %v3204_v9 = vpop.f32.mrb[25].mxu1 }
 0x1de   :  { %v894_v12 = vpop.f32.mrb[26].mxu0  ;;  %v968_v13 = vpop.f32.mrb[26].mxu1  ;;  %v1364_v8 = vrot.slane %v1356_v62, 2  ;;  %v1448_v9 = vrot.slane %v1356_v62, 3  ;;  %v1451_v62 = vrot.slane %v1358_v31, 1 }
 0x1df   :  { %v1124_v16 = vpack.c.bf16 %v894_v12, %v891_v6  ;;  %v1125_v17 = vpack.c.bf16 %v968_v13, %v965_v7  ;;  %v3191_v18 = vpop.f32.mrb[27].mxu0  ;;  %v3205_v19 = vpop.f32.mrb[27].mxu1  ;;  %v1174_v6 = vrot.slane %v1166_v60, 1  ;;  %v1257_v7 = vrot.slane %v1167_v61, 7 }
 0x1e0   :  { %v1365_v12 = vrot.slane %v1357_v0, 1  ;;  %v1449_v13 = vrot.slane %v1357_v0, 2  ;;  %v1259_v18 = vrot.slane %v1168_v4, 6  ;;  %v3905_v19 = vrot.slane %v1549_v5, 3 }
 0x1e1   :  { %1133 = vst.msk [vmem:[#allocation2 + $0x20] sm:$0xff] %vm1128_vm4, %v1124_v16  ;;  %1134 = vst.msk [vmem:[#allocation2 + $0x28] sm:$0xff] %vm1128_vm4, %v1125_v17  ;;  %v1177_v17 = vrot.slane %v1168_v4, 7  ;;  %v1176_v29 = vsel %vm1175_vm5, %v1167_v61, %v1174_v6  ;;  %v1258_v30 = vsel %vm1175_vm5, %v1257_v7, %v1166_v60 }
 0x1e2   :  { %v1260_v43 = vsel %vm1178_vm6, %v1259_v18, %v1258_v30  ;;  %v1366_v46 = vsel %vm1175_vm5, %v1365_v12, %v1364_v8  ;;  %v1450_v47 = vsel %vm1175_vm5, %v1449_v13, %v1448_v9 }
 0x1e3   :  { %v1179_v42 = vsel %vm1178_vm6, %v1177_v17, %v1176_v29  ;;  %v1262_v61 = vsel %vm1181_vm7, %v1261_v40, %v1260_v43 }
 0x1e4   :  { %v1182_v60 = vsel %vm1181_vm7, %v1180_v39, %v1179_v42 }
 0x1e8   :  { %v1141_v24 = vld [vmem:[#allocation2 + $0x20] sm:$0x1]  ;;  %v2297_v26 = vld [vmem:[#allocation2 + $0x20] sm:$0x40]  ;;  %v1142_v38 = vld [vmem:[#allocation2 + $0x28] sm:$0x1] }
 0x1e9   :  { %v1170_v41 = vunpack.c.l.b16 %v1141_v24  ;;  %v2298_v44 = vld [vmem:[#allocation2 + $0x28] sm:$0x40]  ;;  %v2320_v45 = vunpack.c.h.b16 %v2297_v26  ;;  %v2489_v50 = vld [vmem:[#allocation2 + $0x20] sm:$0x80]  ;;  %v1171_v51 = vunpack.c.l.b16 %v1142_v38  ;;  %v1337_v52 = vld [vmem:[#allocation2 + $0x20] sm:$0x2] }
 0x1ea   :  { %v2490_v58 = vld [vmem:[#allocation2 + $0x28] sm:$0x80]  ;;  %v2321_v0 = vunpack.c.h.b16 %v2298_v44  ;;  %v2512_v5 = vunpack.c.h.b16 %v2489_v50  ;;  %v1360_v7 = vunpack.c.l.b16 %v1337_v52  ;;  %v1338_v32 = vld [vmem:[#allocation2 + $0x28] sm:$0x2] }
 0x1eb   :  { %v1183_v2 = vrot.slane %v1170_v41, 5  ;;  %v2331_v3 = vsel %vm1184_vm8, %v2320_v45, %v3888_v53  ;;  %v2415_v4 = vrot.slane %v2320_v45, 1  ;;  %v1263_v6 = vrot.slane %v1170_v41, 4 }
 0x1ec   :  { %v2332_v8 = vrot.slane %v2321_v0, 7  ;;  %v2513_v9 = vunpack.c.h.b16 %v2490_v58  ;;  %v1186_v10 = vrot.slane %v1171_v51, 4  ;;  %v2523_v13 = vrot.slane %v2512_v5, 2 }
 0x1ed   :  { %v2416_v12 = vsel %vm1184_vm8, %v2415_v4, %v3891_v54  ;;  %v1185_v24 = vsel %vm1184_vm8, %v1183_v2, %v1182_v60  ;;  %v1265_v26 = vrot.slane %v1171_v51, 3  ;;  %v1264_v30 = vsel %vm1184_vm8, %v1263_v6, %v1262_v61  ;;  %v3968_v51 = vld [vmem:[#allocation2 + $0x20] sm:$0x4]  ;;  %v3453_v60 = vld [vmem:[%s4343_s3 + $0x30] sm:$0xff]   ;;  %v3454_v61 = vld [vmem:[%s4343_s3 + $0x48] sm:$0xff]  }
 0x1ee   :  { %v3944_v17 = vsel %vm1187_vm9, %v2321_v0, %v2416_v12  ;;  %v2525_v18 = vrot.slane %v2513_v9, 1  ;;  %v2609_v53 = vrot.slane %v2513_v9, 2  ;;  %v1188_v42 = vsel %vm1187_vm9, %v1186_v10, %v1185_v24  ;;  %v1718_v6 = vld [vmem:[#allocation2 + $0x8] sm:$0x8] }
 0x1ef   :  { %v1266_v43 = vsel %vm1187_vm9, %v1265_v26, %v1264_v30  ;;  %v1361_v44 = vunpack.c.l.b16 %v1338_v32  ;;  %v1370_v11 = vrot.slane %v1360_v7, 6  ;;  %v1643_v0 = vrot.slane %v1550_v56, 3  ;;  %v3457_v30 = vld [vmem:[%s4343_s3 + $0x40] sm:$0xff]  }
 0x1f0   :  { %v1039_v15 = vpop.f32.mrb[28].mxu0  ;;  %v1113_v16 = vpop.f32.mrb[28].mxu1  ;;  %v1552_v10 = vunpack.c.l.b16 %v3968_v51  ;;  %v4003_v24 = vrot.slane %v1740_v49, 6 }
 0x1f1   :  { %v3218_v22 = vpop.f32.mrb[29].mxu0  ;;  %v3232_v23 = vpop.f32.mrb[29].mxu1  ;;  %v1456_v9 = vrot.slane %v1361_v44, 6 }
 0x1f2   :  { %v1042_v27 = vpop.f32.mrb[30].mxu0  ;;  %v1116_v28 = vpop.f32.mrb[30].mxu1 }
 0x1f3   :  { %v1126_v34 = vpack.c.bf16 %v1042_v27, %v1039_v15  ;;  %v1127_v35 = vpack.c.bf16 %v1116_v28, %v1113_v16  ;;  %v3219_v36 = vpop.f32.mrb[31].mxu0  ;;  %v3233_v37 = vpop.f32.mrb[31].mxu1  ;;  %v2607_v15 = vrot.slane %v2512_v5, 3  ;;  %v3941_v16 = vsel %vm1187_vm9, %v2332_v8, %v2331_v3 }
 0x1f4   :  { %v2524_v27 = vsel %vm1184_vm8, %v2523_v13, %v3896_v59  ;;  %v1367_v36 = vsel %vm1178_vm6, %v1358_v31, %v1366_v46  ;;  %v1368_v37 = vrot.slane %v1359_v55, 7  ;;  %v1452_v59 = vsel %vm1178_vm6, %v1451_v62, %v1450_v47 }
 0x1f5   :  { %1135 = vst.msk [vmem:[#allocation2 + $0x30] sm:$0xff] %vm1128_vm4, %v1126_v34  ;;  %1136 = vst.msk [vmem:[#allocation2 + $0x38] sm:$0xff] %vm1128_vm4, %v1127_v35  ;;  %v2608_v54 = vsel %vm1184_vm8, %v2607_v15, %v3899_v63  ;;  %v3953_v34 = vsel %vm1187_vm9, %v2525_v18, %v2524_v27  ;;  %v1454_v47 = vrot.slane %v1360_v7, 7  ;;  %v1559_v62 = vrot.slane %v1550_v56, 2  ;;  %v3993_v18 = vld [vmem:[#allocation2 + $0x28] sm:$0x4] }
 0x1f6   :  { %v3962_v63 = vsel %vm1187_vm9, %v2609_v53, %v2608_v54  ;;  %v1369_v4 = vsel %vm1181_vm7, %v1368_v37, %v1367_v36  ;;  %v1453_v5 = vsel %vm1181_vm7, %v1359_v55, %v1452_v59  ;;  %v1372_v8 = vrot.slane %v1361_v44, 5  ;;  %v3456_v55 = vld [vmem:[%s4343_s3 + $0x50] sm:$0xff]   ;;  %v3458_v37 = vld [vmem:[%s4343_s3 + $0x58] sm:$0xff]  }
 0x1f7   :  { %v1371_v56 = vsel %vm1184_vm8, %v1370_v11, %v1369_v4  ;;  %v1455_v13 = vsel %vm1184_vm8, %v1454_v47, %v1453_v5  ;;  %v1558_v53 = vsel %vm1175_vm5, %v3905_v19, %v3903_v14  ;;  %v1561_v54 = vrot.slane %v1551_v57, 1  ;;  %v4025_v36 = vld [vmem:[#allocation2 + $0x10] sm:$0x8]  ;;  %v1720_v5 = vld [vmem:[#allocation2 + $0x18] sm:$0x8] }
 0x1f8   :  { %v1560_v27 = vsel %vm1178_vm6, %v1559_v62, %v1558_v53  ;;  %v1645_v19 = vrot.slane %v1551_v57, 2  ;;  %v1553_v57 = vunpack.c.l.b16 %v3993_v18  ;;  %v3462_v53 = vld [vmem:[%s4343_s3 + $0x80] sm:$0xff]  }
 0x1fc   :  { %v1143_v22 = vld [vmem:[#allocation2 + $0x30] sm:$0x1]  ;;  %v1144_v23 = vld [vmem:[#allocation2 + $0x38] sm:$0x1]  ;;  %v1339_v35 = vld [vmem:[#allocation2 + $0x30] sm:$0x2] }
 0x1fd   :  { %v1172_v28 = vunpack.c.l.b16 %v1143_v22  ;;  %v1173_v29 = vunpack.c.l.b16 %v1144_v23  ;;  %v1340_v46 = vld [vmem:[#allocation2 + $0x38] sm:$0x2]  ;;  %v1362_v50 = vunpack.c.l.b16 %v1339_v35  ;;  %v1642_v22 = vsel %vm1175_vm5, %v3926_v48, %v3907_v20  ;;  %v1531_v26 = vld [vmem:[#allocation2 + $0x30] sm:$0x4]  ;;  %v2300_v44 = vld [vmem:[#allocation2 + $0x38] sm:$0x40] }
 0x1fe   :  { %v1363_v7 = vunpack.c.l.b16 %v1340_v46  ;;  %v1741_v23 = vunpack.c.l.b16 %v1718_v6  ;;  %v1644_v14 = vsel %vm1178_vm6, %v1643_v0, %v1642_v22  ;;  %v1373_v20 = vsel %vm1187_vm9, %v1372_v8, %v1371_v56  ;;  %v2491_v11 = vld [vmem:[#allocation2 + $0x30] sm:$0x80]  ;;  %v1721_v22 = vld [vmem:[#allocation2 + $0x20] sm:$0x8] }
 0x1ff   :  { %v1189_v38 = vrot.slane %v1172_v28, 3  ;;  %v1192_v39 = vrot.slane %v1173_v29, 2  ;;  %v1267_v40 = vrot.slane %v1172_v28, 2  ;;  %v1269_v41 = vrot.slane %v1173_v29, 1 }
 0x200   :  { %v1374_v12 = vrot.slane %v1362_v50, 4  ;;  %v1458_v15 = vrot.slane %v1362_v50, 5  ;;  %v1376_v48 = vrot.slane %v1363_v7, 3  ;;  %v1457_v28 = vsel %vm1187_vm9, %v1456_v9, %v1455_v13 }
 0x201   :  { %v1191_v31 = vsel %vm1190_vm11, %v1189_v38, %v1188_v42  ;;  %v1268_v45 = vsel %vm1190_vm11, %v1267_v40, %v1266_v43  ;;  %v1460_v29 = vrot.slane %v1363_v7, 4  ;;  %v1647_v35 = vrot.slane %v1552_v10, 1  ;;  %v1532_v42 = vld [vmem:[#allocation2 + $0x38] sm:$0x4] }
 0x202   :  { %v1194_v52 = vsel %vm1193_vm10, %v1192_v39, %v1191_v31  ;;  %v1270_v58 = vsel %vm1193_vm10, %v1269_v41, %v1268_v45  ;;  %v1375_v32 = vsel %vm1190_vm11, %v1374_v12, %v1373_v20  ;;  %v1459_v33 = vsel %vm1190_vm11, %v1458_v15, %v1457_v28  ;;  %v2299_v41 = vld [vmem:[#allocation2 + $0x30] sm:$0x40] }
 0x203   :  { %v1195_v2 = vpack.c.b16 %v1194_v52, %v1194_v52  ;;  %v1271_v3 = vpack.c.b16 %v1270_v58, %v1270_v58  ;;  %v1554_v59 = vunpack.c.l.b16 %v1531_v26  ;;  %v4030_v38 = vrot.slane %v1741_v23, 5  ;;  %v2492_v52 = vld [vmem:[#allocation2 + $0x38] sm:$0x80]  ;;  %v3459_v58 = vld [vmem:[%s4343_s3 + $0x60] sm:$0xff]  }
 0x204   :  { %v4034_v39 = vrot.slane %v1740_v49, 7  ;;  %v4036_v40 = vrot.slane %v1741_v23, 6  ;;  %v1562_v43 = vsel %vm1181_vm7, %v1561_v54, %v1560_v27  ;;  %v1377_v31 = vsel %vm1193_vm10, %v1376_v48, %v1375_v32 }
 0x205   :  { %3241 = vmatmul.mubr.msk.bf16.vlgmr.msra.gmra.mrb[32].mxu0 %vm1128_vm4, %v1195_v2  ;;  %3251 = vmatmul.mubr.msk.bf16.vlgmr.msra.gmra.mrb[32].mxu1 %vm1128_vm4, %v1271_v3  ;;  %v1461_v45 = vsel %vm1193_vm10, %v1460_v29, %v1459_v33  ;;  %v1646_v21 = vsel %vm1181_vm7, %v1645_v19, %v1644_v14  ;;  %v1742_v49 = vunpack.c.l.b16 %v4025_v36  ;;  %v1563_v46 = vsel %vm1184_vm8, %v1552_v10, %v1562_v43  ;;  %v3463_v33 = vld [vmem:[%s4343_s3 + $0x70] sm:$0xff]   ;;  %v4113_v43 = vld [vmem:[#allocation2 + $0x8] sm:$0x10] }
 0x206   :  { %3255 = vmatpush3.bf16.msra.mxu0 %v3453_v60  ;;  %3265 = vmatpush3.bf16.msra.mxu1 %v3454_v61  ;;  %v1564_v50 = vrot.slane %v1553_v57, 7  ;;  %v1648_v47 = vsel %vm1184_vm8, %v1647_v35, %v1646_v21  ;;  %v2322_v51 = vunpack.c.h.b16 %v2299_v41  ;;  %v3460_v60 = vld [vmem:[%s4343_s3 + $0x78] sm:$0xff]   ;;  %v1555_v61 = vunpack.c.l.b16 %v1532_v42  ;;  %v1723_v35 = vld [vmem:[#allocation2 + $0x30] sm:$0x8]  ;;  %v4111_v42 = vld [vmem:[#allocation2] sm:$0x10] }
 0x207   :  { %3256 = vmatprep.subr.bf16.mxu0 %v3519_v1  ;;  %3266 = vmatprep.subr.bf16.mxu1 %v3519_v1  ;;  %v1566_v62 = vrot.slane %v1554_v59, 6  ;;  %v2323_v0 = vunpack.c.h.b16 %v2300_v44  ;;  %v2514_v2 = vunpack.c.h.b16 %v2491_v11  ;;  %v1378_v3 = vpack.c.b16 %v1377_v31, %v1377_v31  ;;  %v1911_v21 = vld [vmem:[#allocation2 + $0x10] sm:$0x10] }
 0x208   :  { %3260 = vmatprep.mubr.msk.bf16.mxu0 %vm3520_vm1, %v3519_v1  ;;  %3270 = vmatprep.mubr.msk.bf16.mxu1 %vm3520_vm1, %v3519_v1  ;;  %v1462_v4 = vpack.c.b16 %v1461_v45, %v1461_v45  ;;  %v2334_v6 = vrot.slane %v2322_v51, 6  ;;  %v2418_v7 = vrot.slane %v2322_v51, 7  ;;  %v1650_v8 = vrot.slane %v1554_v59, 7 }
 0x209   :  { %v2336_v9 = vrot.slane %v2323_v0, 5  ;;  %v2420_v10 = vrot.slane %v2323_v0, 6  ;;  %v2515_v56 = vunpack.c.h.b16 %v2492_v52  ;;  %v2527_v15 = vsel %vm1190_vm11, %v2514_v2, %v3953_v34 }
 0x20a   :  { %3257 = vmatpush3.bf16.msra.mxu0 %v3455_v25  ;;  %3267 = vmatpush3.bf16.msra.mxu1 %v3456_v55  ;;  %v2335_v12 = vsel %vm1190_vm11, %v2334_v6, %v3941_v16  ;;  %v2419_v13 = vsel %vm1190_vm11, %v2418_v7, %v3944_v17  ;;  %v2611_v25 = vrot.slane %v2514_v2, 1  ;;  %v3461_v55 = vld [vmem:[%s4343_s3 + $0x68] sm:$0xff]   ;;  %v1743_v23 = vunpack.c.l.b16 %v1720_v5 }
 0x20b   :  { %3258 = vmatprep.subr.bf16.mxu0 %v3519_v1  ;;  %3268 = vmatprep.subr.bf16.mxu1 %v3519_v1  ;;  %v4072_v16 = vsel %vm1193_vm10, %v2336_v9, %v2335_v12  ;;  %v4075_v17 = vsel %vm1193_vm10, %v2420_v10, %v2419_v13  ;;  %v2528_v34 = vrot.slane %v2515_v56, 7  ;;  %v1565_v26 = vsel %vm1187_vm9, %v1564_v50, %v1563_v46  ;;  %v3466_v50 = vld [vmem:[%s4343_s3 + $0xa8] sm:$0xff]   ;;  %v3468_v9 = vld [vmem:[%s4343_s3 + $0xb0] sm:$0xff]   ;;  %v1913_v10 = vld [vmem:[#allocation2 + $0x20] sm:$0x10] }
 0x20c   :  { %v1649_v27 = vsel %vm1187_vm9, %v1553_v57, %v1648_v47  ;;  %v1751_v54 = vrot.slane %v1742_v49, 4  ;;  %v2612_v14 = vsel %vm1190_vm11, %v2611_v25, %v3962_v63  ;;  %v1568_v19 = vrot.slane %v1555_v61, 5  ;;  %v3464_v57 = vld [vmem:[%s4343_s3 + $0x88] sm:$0xff]  }
 0x20d   :  { %v1652_v20 = vrot.slane %v1555_v61, 6  ;;  %v4090_v48 = vsel %vm1193_vm10, %v2528_v34, %v2527_v15  ;;  %v4093_v28 = vsel %vm1193_vm10, %v2515_v56, %v2612_v14  ;;  %v1567_v18 = vsel %vm1190_vm11, %v1566_v62, %v1565_v26  ;;  %v1914_v34 = vld [vmem:[#allocation2 + $0x28] sm:$0x10]  ;;  %v3470_v14 = vld [vmem:[%s4343_s3 + $0xb8] sm:$0xff]  }
 0x20e   :  { %3259 = vmatpush3.bf16.msra.mxu0 %v3457_v30  ;;  %3269 = vmatpush3.bf16.msra.mxu1 %v3458_v37  ;;  %v1651_v29 = vsel %vm1190_vm11, %v1650_v8, %v1649_v27  ;;  %v1722_v30 = vld [vmem:[#allocation2 + $0x28] sm:$0x8]  ;;  %v1744_v63 = vunpack.c.l.b16 %v1721_v22  ;;  %v1835_v32 = vrot.slane %v1742_v49, 5  ;;  %v1750_v36 = vsel %vm1175_vm5, %v4030_v38, %v4003_v24  ;;  %v4118_v49 = vld [vmem:[#allocation2 + $0x38] sm:$0x8] }
 0x20f   :  { %3274 = vmatprep.subr.bf16.mxu0 %v3519_v1  ;;  %3284 = vmatprep.subr.bf16.mxu1 %v3519_v1  ;;  %v1753_v37 = vrot.slane %v1743_v23, 3  ;;  %v1834_v59 = vsel %vm1175_vm5, %v4036_v40, %v4034_v39  ;;  %v1837_v41 = vrot.slane %v1743_v23, 4  ;;  %v1569_v44 = vsel %vm1193_vm10, %v1568_v19, %v1567_v18  ;;  %v3465_v40 = vld [vmem:[%s4343_s3 + $0x90] sm:$0xff]   ;;  %v3467_v8 = vld [vmem:[%s4343_s3 + $0x98] sm:$0xff]  }
 0x210   :  { %v1653_v11 = vsel %vm1193_vm10, %v1652_v20, %v1651_v29  ;;  %v1745_v31 = vunpack.c.l.b16 %v1722_v30  ;;  %v1752_v45 = vsel %vm1178_vm6, %v1751_v54, %v1750_v36  ;;  %v1746_v24 = vunpack.c.l.b16 %v1723_v35  ;;  %v3469_v54 = vld [vmem:[%s4343_s3 + $0xa0] sm:$0xff]   ;;  %v1915_v19 = vld [vmem:[#allocation2 + $0x30] sm:$0x10] }
 0x211   :  { %3261 = vmatmul.mubr.msk.bf16.vlgmr.msra.gmra.mrb[36].mxu0 %vm1128_vm4, %v1378_v3  ;;  %3271 = vmatmul.mubr.msk.bf16.vlgmr.msra.gmra.mrb[36].mxu1 %vm1128_vm4, %v1462_v4  ;;  %v1755_v38 = vrot.slane %v1744_v63, 2  ;;  %v1836_v46 = vsel %vm1178_vm6, %v1835_v32, %v1834_v59  ;;  %v1839_v39 = vrot.slane %v1744_v63, 3  ;;  %v1932_v47 = vunpack.c.h.b16 %v4111_v42  ;;  %v1912_v4 = vld [vmem:[#allocation2 + $0x18] sm:$0x10]  ;;  %v2101_v63 = vld [vmem:[#allocation2] sm:$0x20] }
 0x212   :  { %3275 = vmatpush3.bf16.msra.mxu0 %v3459_v58  ;;  %3285 = vmatpush3.bf16.msra.mxu1 %v3460_v60  ;;  %v1933_v51 = vunpack.c.h.b16 %v4113_v43  ;;  %v1570_v52 = vpack.c.b16 %v1569_v44, %v1569_v44  ;;  %v1654_v58 = vpack.c.b16 %v1653_v11, %v1653_v11  ;;  %v1754_v60 = vsel %vm1181_vm7, %v1753_v37, %v1752_v45  ;;  %v2102_v32 = vld [vmem:[#allocation2 + $0x8] sm:$0x20]  ;;  %v4167_v37 = vld [vmem:[#allocation2 + $0x10] sm:$0x20]  ;;  %v1916_v59 = vld [vmem:[#allocation2 + $0x38] sm:$0x10] }
 0x213   :  { %3276 = vmatprep.subr.bf16.mxu0 %v3519_v1  ;;  %3286 = vmatprep.subr.bf16.mxu1 %v3519_v1  ;;  %v1934_v61 = vunpack.c.h.b16 %v1911_v21  ;;  %v1747_v62 = vunpack.c.l.b16 %v4118_v49  ;;  %v1757_v0 = vrot.slane %v1745_v31, 1  ;;  %v1838_v2 = vsel %vm1181_vm7, %v1837_v41, %v1836_v46  ;;  %v3471_v11 = vld [vmem:[%s4343_s3 + $0xc0] sm:$0xff]  }
 0x214   :  { %3280 = vmatprep.mubr.msk.bf16.mxu0 %vm3520_vm1, %v3519_v1  ;;  %3290 = vmatprep.mubr.msk.bf16.mxu1 %vm3520_vm1, %v3519_v1  ;;  %v1841_v3 = vrot.slane %v1745_v31, 2  ;;  %v1756_v5 = vsel %vm1184_vm8, %v1755_v38, %v1754_v60  ;;  %v1840_v6 = vsel %vm1184_vm8, %v1839_v39, %v1838_v2  ;;  %v1843_v7 = vrot.slane %v1746_v24, 1  ;;  %v3472_v31 = vld [vmem:[%s4343_s3 + $0xd8] sm:$0xff]   ;;  %v2105_v2 = vld [vmem:[#allocation2 + $0x20] sm:$0x20] }
 0x215   :  { %v1935_v56 = vunpack.c.h.b16 %v1912_v4  ;;  %v1940_v12 = vrot.slane %v1933_v51, 7  ;;  %v2024_v13 = vrot.slane %v1932_v47, 1  ;;  %v1758_v15 = vsel %vm1187_vm9, %v1757_v0, %v1756_v5  ;;  %v3474_v0 = vld [vmem:[%s4343_s3 + $0xe0] sm:$0xff]  }
 0x216   :  { %3277 = vmatpush3.bf16.msra.mxu0 %v3461_v55  ;;  %3287 = vmatpush3.bf16.msra.mxu1 %v3462_v53  ;;  %v1760_v25 = vrot.slane %v1747_v62, 7  ;;  %v1842_v55 = vsel %vm1187_vm9, %v1841_v3, %v1840_v6  ;;  %v1942_v53 = vrot.slane %v1934_v61, 6  ;;  %v1759_v22 = vsel %vm1190_vm11, %v1746_v24, %v1758_v15  ;;  %v2106_v15 = vld [vmem:[#allocation2 + $0x28] sm:$0x20] }
 0x217   :  { %3278 = vmatprep.subr.bf16.mxu0 %v3519_v1  ;;  %3288 = vmatprep.subr.bf16.mxu1 %v3519_v1  ;;  %v1844_v23 = vsel %vm1190_vm11, %v1843_v7, %v1842_v55  ;;  %v1936_v26 = vunpack.c.h.b16 %v1913_v10  ;;  %v2026_v27 = vrot.slane %v1934_v61, 7  ;;  %v1941_v20 = vsel %vm1175_vm5, %v1940_v12, %v1932_v47 }
 0x218   :  { %v1944_v18 = vrot.slane %v1935_v56, 5  ;;  %v2025_v29 = vsel %vm1175_vm5, %v1933_v51, %v2024_v13  ;;  %v2028_v30 = vrot.slane %v1935_v56, 6  ;;  %v1937_v35 = vunpack.c.h.b16 %v1914_v34  ;;  %v2104_v51 = vld [vmem:[#allocation2 + $0x18] sm:$0x20] }
 0x219   :  { %v1943_v36 = vsel %vm1178_vm6, %v1942_v53, %v1941_v20  ;;  %v1938_v41 = vunpack.c.h.b16 %v1915_v19  ;;  %v1946_v42 = vrot.slane %v1936_v26, 4  ;;  %v2027_v43 = vsel %vm1178_vm6, %v2026_v27, %v2025_v29  ;;  %v3475_v53 = vld [vmem:[%s4343_s3 + $0xd0] sm:$0xff]  }
 0x21a   :  { %3279 = vmatpush3.bf16.msra.mxu0 %v3463_v33  ;;  %3289 = vmatpush3.bf16.msra.mxu1 %v3464_v57  ;;  %v1761_v33 = vsel %vm1193_vm10, %v1760_v25, %v1759_v22  ;;  %v1845_v57 = vsel %vm1193_vm10, %v1747_v62, %v1844_v23  ;;  %v2030_v44 = vrot.slane %v1936_v26, 5  ;;  %v2124_v45 = vunpack.c.h.b16 %v2101_v63  ;;  %v3473_v62 = vld [vmem:[%s4343_s3 + $0xc8] sm:$0xff]   ;;  %v2107_v23 = vld [vmem:[#allocation2 + $0x30] sm:$0x20] }
 0x21b   :  { %3294 = vmatprep.subr.bf16.mxu0 %v3519_v1  ;;  %3304 = vmatprep.subr.bf16.mxu1 %v3519_v1  ;;  %v2125_v21 = vunpack.c.h.b16 %v2102_v32  ;;  %v1762_v49 = vpack.c.b16 %v1761_v33, %v1761_v33  ;;  %v1846_v24 = vpack.c.b16 %v1845_v57, %v1845_v57  ;;  %v1945_v38 = vsel %vm1181_vm7, %v1944_v18, %v1943_v36  ;;  %v3476_v22 = vld [vmem:[%s4343_s3 + $0xe8] sm:$0xff]   ;;  %v2108_v18 = vld [vmem:[#allocation2 + $0x38] sm:$0x20]  ;;  %v3477_v33 = vld [vmem:[%s4343_s3 + $0xf0] sm:$0xff]  }
 0x21c   :  { %v2126_v46 = vunpack.c.h.b16 %v4167_v37  ;;  %v1939_v39 = vunpack.c.h.b16 %v1916_v59  ;;  %v2032_v47 = vrot.slane %v1937_v35, 4  ;;  %v2034_v61 = vrot.slane %v1938_v41, 3  ;;  %v3478_v57 = vld [vmem:[%s4343_s3 + $0x108] sm:$0xff]  }
 0x21d   :  { %3281 = vmatmul.mubr.msk.bf16.vlgmr.msra.gmra.mrb[40].mxu0 %vm1128_vm4, %v1570_v52  ;;  %3291 = vmatmul.mubr.msk.bf16.vlgmr.msra.gmra.mrb[40].mxu1 %vm1128_vm4, %v1654_v58  ;;  %v1947_v52 = vsel %vm1184_vm8, %v1946_v42, %v1945_v38  ;;  %v1950_v58 = vrot.slane %v1938_v41, 2  ;;  %v2132_v3 = vrot.slane %v2124_v45, 2  ;;  %v2127_v4 = vunpack.c.h.b16 %v2104_v51  ;;  %v3482_v51 = vld [vmem:[%s4343_s3 + $0x118] sm:$0xff]  }
 0x21e   :  { %3295 = vmatpush3.bf16.msra.mxu0 %v3465_v40  ;;  %3305 = vmatpush3.bf16.msra.mxu1 %v3466_v50  ;;  %v1948_v40 = vrot.slane %v1937_v35, 3  ;;  %v2029_v50 = vsel %vm1181_vm7, %v2028_v30, %v2027_v43  ;;  %v2133_v5 = vrot.slane %v2125_v21, 1  ;;  %v2216_v6 = vrot.slane %v2124_v45, 3 }
 0x21f   :  { %3296 = vmatprep.subr.bf16.mxu0 %v3519_v1  ;;  %3306 = vmatprep.subr.bf16.mxu1 %v3519_v1  ;;  %v2031_v60 = vsel %vm1184_vm8, %v2030_v44, %v2029_v50  ;;  %v2217_v7 = vrot.slane %v2125_v21, 2  ;;  %v2036_v56 = vrot.slane %v1939_v39, 2  ;;  %v2128_v25 = vunpack.c.h.b16 %v2105_v2  ;;  %v3479_v21 = vld [vmem:[%s4343_s3 + $0xf8] sm:$0xff]   ;;  %v3485_v2 = vld [vmem:[%s4343_s3 + $0x128] sm:$0xff]  }
 0x220   :  { %3300 = vmatprep.mubr.msk.bf16.mxu0 %vm3520_vm1, %v3519_v1  ;;  %3310 = vmatprep.mubr.msk.bf16.mxu1 %vm3520_vm1, %v3519_v1  ;;  %v2033_v10 = vsel %vm1187_vm9, %v2032_v47, %v2031_v60  ;;  %v2219_v55 = vrot.slane %v2126_v46, 1  ;;  %v2134_v34 = vsel %vm1175_vm5, %v2133_v5, %v2132_v3  ;;  %v2136_v26 = vrot.slane %v2127_v4, 7  ;;  %v3481_v47 = vld [vmem:[%s4343_s3 + $0x100] sm:$0xff]   ;;  %v3488_v5 = vld [vmem:[%s4343_s3 + $0x148] sm:$0xff]  }
 0x221   :  { %v2035_v13 = vsel %vm1190_vm11, %v2034_v61, %v2033_v10  ;;  %v2218_v27 = vsel %vm1175_vm5, %v2217_v7, %v2216_v6  ;;  %v2129_v19 = vunpack.c.h.b16 %v2106_v15  ;;  %v2135_v20 = vsel %vm1178_vm6, %v2126_v46, %v2134_v34  ;;  %v3483_v60 = vld [vmem:[%s4343_s3 + $0x120] sm:$0xff]   ;;  %v3484_v61 = vld [vmem:[%s4343_s3 + $0x138] sm:$0xff]   ;;  %v3489_v6 = vld [vmem:[%s4343_s3 + $0x150] sm:$0xff]  }
 0x222   :  { %3297 = vmatpush3.bf16.msra.mxu0 %v3467_v8  ;;  %3307 = vmatpush3.bf16.msra.mxu1 %v3468_v9  ;;  %v1949_v8 = vsel %vm1187_vm9, %v1948_v40, %v1947_v52  ;;  %v1952_v9 = vrot.slane %v1939_v39, 1  ;;  %v2130_v29 = vunpack.c.h.b16 %v2107_v23  ;;  %v2138_v30 = vrot.slane %v2128_v25, 6  ;;  %v3486_v3 = vld [vmem:[%s4343_s3 + $0x140] sm:$0xff]   ;;  %v3490_v7 = vld [vmem:[%s4343_s3 + $0x168] sm:$0xff]   ;;  %v3491_v10 = vld [vmem:[%s4343_s3 + $0x158] sm:$0xff]  }
 0x223   :  { %3298 = vmatprep.subr.bf16.mxu0 %v3519_v1  ;;  %3308 = vmatprep.subr.bf16.mxu1 %v3519_v1  ;;  %v1951_v12 = vsel %vm1190_vm11, %v1950_v58, %v1949_v8  ;;  %v2220_v63 = vsel %vm1178_vm6, %v2219_v55, %v2218_v27  ;;  %v2222_v32 = vrot.slane %v2128_v25, 7  ;;  %v2137_v37 = vsel %vm1181_vm7, %v2136_v26, %v2135_v20 }
 0x224   :  { %v2131_v59 = vunpack.c.h.b16 %v2108_v18  ;;  %v2140_v41 = vrot.slane %v2129_v19, 5  ;;  %v2221_v42 = vsel %vm1181_vm7, %v2127_v4, %v2220_v63  ;;  %v2224_v43 = vrot.slane %v2129_v19, 6  ;;  %v3487_v4 = vld [vmem:[%s4343_s3 + $0x130] sm:$0xff]  }
 0x225   :  { %v2139_v44 = vsel %vm1184_vm8, %v2138_v30, %v2137_v37  ;;  %v2226_v45 = vrot.slane %v2130_v29, 5  ;;  %v2338_v8 = vpack.c.b16 %v4072_v16, %v4072_v16  ;;  %v3492_v16 = vld [vmem:[%s4343_s3 + $0x170] sm:$0xff]  }
 0x226   :  { %3299 = vmatpush3.bf16.msra.mxu0 %v3469_v54  ;;  %3309 = vmatpush3.bf16.msra.mxu1 %v3470_v14  ;;  %v1953_v54 = vsel %vm1193_vm10, %v1952_v9, %v1951_v12  ;;  %v2037_v14 = vsel %vm1193_vm10, %v2036_v56, %v2035_v13  ;;  %v2144_v38 = vrot.slane %v2131_v59, 3  ;;  %v2228_v39 = vrot.slane %v2131_v59, 4  ;;  %v3494_v56 = vld [vmem:[%s4343_s3 + $0x178] sm:$0xff]  }
 0x227   :  { %3314 = vmatprep.subr.bf16.mxu0 %v3519_v1  ;;  %3324 = vmatprep.subr.bf16.mxu1 %v3519_v1  ;;  %v1954_v35 = vpack.c.b16 %v1953_v54, %v1953_v54  ;;  %v2038_v36 = vpack.c.b16 %v2037_v14, %v2037_v14  ;;  %v2422_v9 = vpack.c.b16 %v4075_v17, %v4075_v17  ;;  %v3493_v17 = vld [vmem:[%s4343_s3 + $0x160] sm:$0xff]  }
 0x228   :  { %v2530_v12 = vpack.c.b16 %v4090_v48, %v4090_v48  ;;  %v2614_v13 = vpack.c.b16 %v4093_v28, %v4093_v28 }
 0x229   :  { %3301 = vmatmul.mubr.msk.bf16.vlgmr.msra.gmra.mrb[44].mxu0 %vm1128_vm4, %v1762_v49  ;;  %3311 = vmatmul.mubr.msk.bf16.vlgmr.msra.gmra.mrb[44].mxu1 %vm1128_vm4, %v1846_v24  ;;  %v3480_v49 = vld [vmem:[%s4343_s3 + $0x110] sm:$0xff]   ;;  %v2141_v24 = vsel %vm1187_vm9, %v2140_v41, %v2139_v44 }
 0x22a   :  { %3315 = vmatpush3.bf16.msra.mxu0 %v3471_v11  ;;  %3325 = vmatpush3.bf16.msra.mxu1 %v3472_v31  ;;  %v2142_v11 = vrot.slane %v2130_v29, 4  ;;  %v2223_v31 = vsel %vm1184_vm8, %v2222_v32, %v2221_v42 }
 0x22b   :  { %3316 = vmatprep.subr.bf16.mxu0 %v3519_v1  ;;  %3326 = vmatprep.subr.bf16.mxu1 %v3519_v1  ;;  %v2225_v46 = vsel %vm1187_vm9, %v2224_v43, %v2223_v31 }
 0x22c   :  { %3320 = vmatprep.mubr.msk.bf16.mxu0 %vm3520_vm1, %v3519_v1  ;;  %3330 = vmatprep.mubr.msk.bf16.mxu1 %vm3520_vm1, %v3519_v1  ;;  %v2143_v40 = vsel %vm1190_vm11, %v2142_v11, %v2141_v24  ;;  %v2227_v50 = vsel %vm1190_vm11, %v2226_v45, %v2225_v46 }
 0x22d   :  { %v2145_v52 = vsel %vm1193_vm10, %v2144_v38, %v2143_v40  ;;  %v2229_v58 = vsel %vm1193_vm10, %v2228_v39, %v2227_v50 }
 0x22e   :  { %3317 = vmatpush3.bf16.msra.mxu0 %v3473_v62  ;;  %3327 = vmatpush3.bf16.msra.mxu1 %v3474_v0  ;;  %v2146_v62 = vpack.c.b16 %v2145_v52, %v2145_v52  ;;  %v2230_v0 = vpack.c.b16 %v2229_v58, %v2229_v58 }
 0x22f   :  { %3318 = vmatprep.subr.bf16.mxu0 %v3519_v1  ;;  %3328 = vmatprep.subr.bf16.mxu1 %v3519_v1 }
 0x232   :  { %3319 = vmatpush3.bf16.msra.mxu0 %v3475_v53  ;;  %3329 = vmatpush3.bf16.msra.mxu1 %v3476_v22 }
 0x233   :  { %3334 = vmatprep.subr.bf16.mxu0 %v3519_v1  ;;  %3344 = vmatprep.subr.bf16.mxu1 %v3519_v1 }
 0x235   :  { %3321 = vmatmul.mubr.msk.bf16.vlgmr.msra.gmra.mrb[48].mxu0 %vm1128_vm4, %v1954_v35  ;;  %3331 = vmatmul.mubr.msk.bf16.vlgmr.msra.gmra.mrb[48].mxu1 %vm1128_vm4, %v2038_v36 }
 0x236   :  { %3335 = vmatpush3.bf16.msra.mxu0 %v3477_v33  ;;  %3345 = vmatpush3.bf16.msra.mxu1 %v3478_v57 }
 0x237   :  { %3336 = vmatprep.subr.bf16.mxu0 %v3519_v1  ;;  %3346 = vmatprep.subr.bf16.mxu1 %v3519_v1 }
 0x238   :  { %3340 = vmatprep.mubr.msk.bf16.mxu0 %vm3520_vm1, %v3519_v1  ;;  %3350 = vmatprep.mubr.msk.bf16.mxu1 %vm3520_vm1, %v3519_v1 }
 0x23a   :  { %3337 = vmatpush3.bf16.msra.mxu0 %v3479_v21  ;;  %3347 = vmatpush3.bf16.msra.mxu1 %v3480_v49 }
 0x23b   :  { %3338 = vmatprep.subr.bf16.mxu0 %v3519_v1  ;;  %3348 = vmatprep.subr.bf16.mxu1 %v3519_v1 }
 0x23e   :  { %3339 = vmatpush3.bf16.msra.mxu0 %v3481_v47  ;;  %3349 = vmatpush3.bf16.msra.mxu1 %v3482_v51 }
 0x23f   :  { %3354 = vmatprep.subr.bf16.mxu0 %v3519_v1  ;;  %3364 = vmatprep.subr.bf16.mxu1 %v3519_v1 }
 0x241   :  { %3341 = vmatmul.mubr.msk.bf16.vlgmr.msra.gmra.mrb[52].mxu0 %vm1128_vm4, %v2146_v62  ;;  %3351 = vmatmul.mubr.msk.bf16.vlgmr.msra.gmra.mrb[52].mxu1 %vm1128_vm4, %v2230_v0 }
 0x242   :  { %3355 = vmatpush3.bf16.msra.mxu0 %v3483_v60  ;;  %3365 = vmatpush3.bf16.msra.mxu1 %v3484_v61 }
 0x243   :  { %3356 = vmatprep.subr.bf16.mxu0 %v3519_v1  ;;  %3366 = vmatprep.subr.bf16.mxu1 %v3519_v1 }
 0x244   :  { %3360 = vmatprep.mubr.msk.bf16.mxu0 %vm3520_vm1, %v3519_v1  ;;  %3370 = vmatprep.mubr.msk.bf16.mxu1 %vm3520_vm1, %v3519_v1 }
 0x246   :  { %3357 = vmatpush3.bf16.msra.mxu0 %v3485_v2  ;;  %3367 = vmatpush3.bf16.msra.mxu1 %v3486_v3 }
 0x247   :  { %3358 = vmatprep.subr.bf16.mxu0 %v3519_v1  ;;  %3368 = vmatprep.subr.bf16.mxu1 %v3519_v1 }
 0x24a   :  { %3359 = vmatpush3.bf16.msra.mxu0 %v3487_v4  ;;  %3369 = vmatpush3.bf16.msra.mxu1 %v3488_v5 }
 0x24b   :  { %3374 = vmatprep.subr.bf16.mxu0 %v3519_v1  ;;  %3384 = vmatprep.subr.bf16.mxu1 %v3519_v1 }
 0x24d   :  { %3361 = vmatmul.mubr.msk.bf16.vlgmr.msra.gmra.mrb[56].mxu0 %vm1128_vm4, %v2338_v8  ;;  %3371 = vmatmul.mubr.msk.bf16.vlgmr.msra.gmra.mrb[56].mxu1 %vm1128_vm4, %v2422_v9 }
 0x24e   :  { %3375 = vmatpush3.bf16.msra.mxu0 %v3489_v6  ;;  %3385 = vmatpush3.bf16.msra.mxu1 %v3490_v7 }
 0x24f   :  { %3376 = vmatprep.subr.bf16.mxu0 %v3519_v1  ;;  %3386 = vmatprep.subr.bf16.mxu1 %v3519_v1 }
 0x250   :  { %3380 = vmatprep.mubr.msk.bf16.mxu0 %vm3520_vm1, %v3519_v1  ;;  %3390 = vmatprep.mubr.msk.bf16.mxu1 %vm3520_vm1, %v3519_v1 }
 0x252   :  { %3377 = vmatpush3.bf16.msra.mxu0 %v3491_v10  ;;  %3387 = vmatpush3.bf16.msra.mxu1 %v3492_v16 }
 0x253   :  { %3378 = vmatprep.subr.bf16.mxu0 %v3519_v1  ;;  %3388 = vmatprep.subr.bf16.mxu1 %v3519_v1 }
 0x256   :  { %3379 = vmatpush3.bf16.msra.mxu0 %v3493_v17  ;;  %3389 = vmatpush3.bf16.msra.mxu1 %v3494_v56 }
 0x259   :  { %3381 = vmatmul.mubr.msk.bf16.vlgmr.msra.gmra.mrb[60].mxu0 %vm1128_vm4, %v2530_v12  ;;  %3391 = vmatmul.mubr.msk.bf16.vlgmr.msra.gmra.mrb[60].mxu1 %vm1128_vm4, %v2614_v13 }
 0x2d8   :  { %v1251_v15 = vpop.f32.mrb[32].mxu0  ;;  %v1327_v25 = vpop.f32.mrb[32].mxu1 }
 0x2d9   :  { %v1328_v55 = vadd.f32 %v1327_v25, %v1251_v15  ;;  %v3242_v53 = vpop.f32.mrb[33].mxu0  ;;  %v3252_v22 = vpop.f32.mrb[33].mxu1 }
 0x2da   :  { %v1254_v23 = vpop.f32.mrb[34].mxu0  ;;  %v1330_v34 = vpop.f32.mrb[34].mxu1 }
 0x2db   :  { %v3243_v1 = vpop.f32.mrb[35].mxu0  ;;  %v3253_v26 = vpop.f32.mrb[35].mxu1 }
 0x2e4   :  { %v1434_v27 = vpop.f32.mrb[36].mxu0  ;;  %v1518_v54 = vpop.f32.mrb[36].mxu1 }
 0x2e5   :  { %v1440_v14 = vadd.f32 %v1434_v27, %v1328_v55  ;;  %v3262_v48 = vpop.f32.mrb[37].mxu0  ;;  %v3272_v19 = vpop.f32.mrb[37].mxu1 }
 0x2e6   :  { %v1437_v20 = vpop.f32.mrb[38].mxu0  ;;  %v1521_v28 = vpop.f32.mrb[38].mxu1 }
 0x2e7   :  { %v1524_v18 = vadd.f32 %v1518_v54, %v1440_v14  ;;  %v3263_v29 = vpop.f32.mrb[39].mxu0  ;;  %v3273_v30 = vpop.f32.mrb[39].mxu1  ;;  %v2921_v54 = vld [vmem:[%s4344_s4] ss:$0 sm:$0xff] }
 0x2f0   :  { %v1626_v63 = vpop.f32.mrb[40].mxu0  ;;  %v1710_v32 = vpop.f32.mrb[40].mxu1 }
 0x2f1   :  { %v1632_v33 = vadd.f32 %v1626_v63, %v1524_v18  ;;  %v3282_v57 = vpop.f32.mrb[41].mxu0  ;;  %v3292_v35 = vpop.f32.mrb[41].mxu1 }
 0x2f2   :  { %v1629_v36 = vpop.f32.mrb[42].mxu0  ;;  %v1713_v37 = vpop.f32.mrb[42].mxu1 }
 0x2f3   :  { %v1716_v59 = vadd.f32 %v1710_v32, %v1632_v33  ;;  %v3283_v41 = vpop.f32.mrb[43].mxu0  ;;  %v3293_v42 = vpop.f32.mrb[43].mxu1 }
 0x2fc   :  { %v1818_v43 = vpop.f32.mrb[44].mxu0  ;;  %v1902_v44 = vpop.f32.mrb[44].mxu1 }
 0x2fd   :  { %v1824_v11 = vadd.f32 %v1818_v43, %v1716_v59  ;;  %v3302_v31 = vpop.f32.mrb[45].mxu0  ;;  %v3312_v45 = vpop.f32.mrb[45].mxu1 }
 0x2fe   :  { %v1821_v21 = vpop.f32.mrb[46].mxu0  ;;  %v1905_v49 = vpop.f32.mrb[46].mxu1 }
 0x2ff   :  { %v1908_v24 = vadd.f32 %v1902_v44, %v1824_v11  ;;  %v3303_v38 = vpop.f32.mrb[47].mxu0  ;;  %v3313_v46 = vpop.f32.mrb[47].mxu1 }
 0x308   :  { %v2010_v39 = vpop.f32.mrb[48].mxu0  ;;  %v2094_v40 = vpop.f32.mrb[48].mxu1 }
 0x309   :  { %v2016_v50 = vadd.f32 %v2010_v39, %v1908_v24  ;;  %v3322_v47 = vpop.f32.mrb[49].mxu0  ;;  %v3332_v51 = vpop.f32.mrb[49].mxu1 }
 0x30a   :  { %v2013_v52 = vpop.f32.mrb[50].mxu0  ;;  %v2097_v58 = vpop.f32.mrb[50].mxu1 }
 0x30b   :  { %v2100_v60 = vadd.f32 %v2094_v40, %v2016_v50  ;;  %v3323_v61 = vpop.f32.mrb[51].mxu0  ;;  %v3333_v62 = vpop.f32.mrb[51].mxu1 }
 0x314   :  { %v2202_v0 = vpop.f32.mrb[52].mxu0  ;;  %v2286_v2 = vpop.f32.mrb[52].mxu1 }
 0x315   :  { %v2208_v3 = vadd.f32 %v2202_v0, %v2100_v60  ;;  %v3342_v4 = vpop.f32.mrb[53].mxu0  ;;  %v3352_v5 = vpop.f32.mrb[53].mxu1 }
 0x316   :  { %v2205_v6 = vpop.f32.mrb[54].mxu0  ;;  %v2289_v7 = vpop.f32.mrb[54].mxu1 }
 0x317   :  { %v2292_v8 = vadd.f32 %v2286_v2, %v2208_v3  ;;  %v3343_v9 = vpop.f32.mrb[55].mxu0  ;;  %v3353_v10 = vpop.f32.mrb[55].mxu1 }
 0x320   :  { %v2394_v16 = vpop.f32.mrb[56].mxu0  ;;  %v2478_v17 = vpop.f32.mrb[56].mxu1 }
 0x321   :  { %v2400_v56 = vadd.f32 %v2394_v16, %v2292_v8  ;;  %v3362_v12 = vpop.f32.mrb[57].mxu0  ;;  %v3372_v13 = vpop.f32.mrb[57].mxu1 }
 0x322   :  { %v2397_v15 = vpop.f32.mrb[58].mxu0  ;;  %v2481_v25 = vpop.f32.mrb[58].mxu1 }
 0x323   :  { %v2484_v55 = vadd.f32 %v2478_v17, %v2400_v56  ;;  %v3363_v53 = vpop.f32.mrb[59].mxu0  ;;  %v3373_v22 = vpop.f32.mrb[59].mxu1 }
 0x32c   :  { %v2586_v23 = vpop.f32.mrb[60].mxu0  ;;  %v2670_v34 = vpop.f32.mrb[60].mxu1 }
 0x32d   :  { %v2592_v1 = vadd.f32 %v2586_v23, %v2484_v55  ;;  %v3382_v26 = vpop.f32.mrb[61].mxu0  ;;  %v3392_v27 = vpop.f32.mrb[61].mxu1 }
 0x32e   :  { %v2589_v14 = vpop.f32.mrb[62].mxu0  ;;  %v2673_v48 = vpop.f32.mrb[62].mxu1 }
 0x32f   :  { %v2676_v19 = vadd.f32 %v2670_v34, %v2592_v1  ;;  %v3383_v20 = vpop.f32.mrb[63].mxu0  ;;  %v3393_v28 = vpop.f32.mrb[63].mxu1 }
 0x331   :  { %v2684_v18 = vadd.f32 %v2921_v54, %v2676_v19 }
 0x333   :  { %2686 = vst.msk [vmem:[#allocation3] sm:$0xff] %vm2685_vm12, %v2684_v18 }
 0x334   :  { %3506 = shalt.err (!%p3503_p4)
}
 0x335   :  { %s3507_s25 = scalar_lea.hbm %s4345_s5, 128 }
 0x336   :  { %p3508_p5 = scmp.ne.s32.totalorder %s4345_s5, %s3507_s25  ;;  %p3511_p6 = scmp.lt.u32.totalorder %s3507_s25, %s4345_s5 }
 0x338   :  { %p3513_p7 = pnand %p3511_p6, %p3508_p5 }
 0x33a   :  { %3516 = shalt.err (!%p3513_p7)
}
 0x33b   :  { %2696 = dma.vmem_to_hbm [thread:$0]  %s2694_s23, 128, %s4345_s5, [#allocation4]  }
 0x33c   :  { %3517 = dma.done.wait [#allocation4], 128  }
 0x33d   :  { %3518 = vsyncadd [#allocation4], 4294967168 }
 0x33e   :  { %2700 = vsyncpa [#allocation4], 1 }

</bundles_post_ra>
